<compile_context>
chip_gen: v7x
topology: tpu7x:2x2x1
jax: 0.10.0
libtpu: 0.0.40
codegen_flags: <defaults>
</compile_context>

<pallas_src>
import jax
import jax.numpy as jnp
from jax.experimental import pallas as pl
from jax.experimental.pallas import tpu as pltpu

KSIZE = 5
PAD = KSIZE // 2
NGROUPS = 8
EPS = 1e-5
LANE = 128


def _round_up(x, m):
    return (x + m - 1) // m * m


def _mish_ref(v):
    return v * jnp.tanh(jax.nn.softplus(v))


def _mish_fast(v):
    # mish(x) = x * tanh(softplus(x)) = x * e*(e+2) / (e*(e+2) + 2),  e = exp(x)
    e = jnp.exp(jnp.minimum(v, 20.0))
    n = e * (e + 2.0)
    return v * n * pl.reciprocal(n + 2.0, approx=True)


def _groupnorm(h, gamma, beta, gmat_scaled, gmat_t):
    # h: (T, C) f32.  Group statistics via indicator-matrix matmuls (no lane
    # reshapes); gmat_scaled is the indicator pre-divided by (T * ch_per_group).
    # Merged stat matmuls: [sum;sumsq] -> (2,G), then [mean;var] -> (2,C).
    stats_c = jnp.concatenate(
        [jnp.sum(h, axis=0, keepdims=True),
         jnp.sum(h * h, axis=0, keepdims=True)], axis=0)            # (2, C)
    stats_g = jnp.dot(stats_c, gmat_scaled,
                      preferred_element_type=jnp.float32)            # (2, G)
    mean_g = stats_g[0:1, :]
    var_g = jnp.maximum(stats_g[1:2, :] - mean_g * mean_g, 0.0)      # clamp cancellation
    mv_c = jnp.dot(jnp.concatenate([mean_g, var_g], axis=0), gmat_t,
                   preferred_element_type=jnp.float32)               # (2, C)
    mean_c = mv_c[0:1, :]
    var_c = mv_c[1:2, :]
    return (h - mean_c) * jax.lax.rsqrt(var_c + EPS) * gamma + beta


def resblock_kernel(xh_ref, emb_ref, wa_ref, w2_ref, pvec_ref, gmat_ref,
                    out_ref):
    t = xh_ref.shape[1] - 2 * PAD
    cin = xh_ref.shape[2]
    coutp = out_ref.shape[1]

    # packed per-channel parameter rows
    b1 = pvec_ref[0:1, :]
    g1w = pvec_ref[1:2, :]
    g1b = pvec_ref[2:3, :]
    b2 = pvec_ref[3:4, :]
    g2w = pvec_ref[4:5, :]
    g2b = pvec_ref[5:6, :]
    br = pvec_ref[6:7, :]
    gmat_t = pvec_ref[7:7 + NGROUPS, :]       # (G, C) indicator
    gmat_s = gmat_ref[...]                    # (C, G) indicator / (T * cpg)

    # ---- conv1 (k=5) + residual 1x1: K accumulating bf16 matmuls over the
    # zero-halo'd input; the residual weight sits at the centre tap of the
    # right half of wa, so `both` carries [acc1 | res]. ----
    xh = xh_ref[0]                            # (T + 2*PAD, CIN) bf16
    both = jnp.dot(xh[0:t, :], wa_ref[0:cin, :],
                   preferred_element_type=jnp.float32)               # (T, 2C)
    for k in range(1, KSIZE):
        both = both + jnp.dot(xh[k:k + t, :],
                              wa_ref[k * cin:(k + 1) * cin, :],
                              preferred_element_type=jnp.float32)

    # Park the residual in the output buffer immediately (already in NCW
    # layout) to kill its long live range across GN/Mish/conv2.
    out_ref[0] = (both[:, coutp:] + br).T                            # (C, T)

    acc1 = both[:, :coutp] + b1
    h1 = _mish_fast(_groupnorm(acc1, g1w, g1b, gmat_s, gmat_t))

    # cond embedding Linear(Mish(cond)) was precomputed in the wrapper.
    h = h1 + emb_ref[0]                                              # (T, C) f32

    # ---- conv2: cast to bf16 once, zero-halo in bf16, K accumulating matmuls
    # (per-tap contraction = COUT_P) -- no (T, K*C) im2col intermediate. ----
    h_bf = h.astype(jnp.bfloat16)
    zpad = jnp.zeros((PAD, coutp), jnp.bfloat16)
    hpad = jnp.concatenate([zpad, h_bf, zpad], axis=0)               # (T+4, C)
    acc2 = b2 + jnp.dot(hpad[0:t, :], w2_ref[0:coutp, :],
                        preferred_element_type=jnp.float32)
    for k in range(1, KSIZE):
        acc2 = acc2 + jnp.dot(hpad[k:k + t, :],
                              w2_ref[k * coutp:(k + 1) * coutp, :],
                              preferred_element_type=jnp.float32)
    h2 = _mish_fast(_groupnorm(acc2, g2w, g2b, gmat_s, gmat_t))

    out_ref[0] = out_ref[0] + h2.T


def resblock_forward(x, cond, params):
    """x: (B, CIN, T) float32 (PyTorch NCW); cond: (B, COND_DIM) float32.
    Returns (B, COUT, T) float32."""
    B, CIN, T = x.shape
    COUT = params["w1"].shape[2]
    COUT_P = _round_up(COUT, LANE)
    pad_c = COUT_P - COUT
    cpg = COUT // NGROUPS
    KC = KSIZE * CIN
    f32, bf16 = jnp.float32, jnp.bfloat16

    # NCW -> NWC with a zero halo of PAD rows per side; the 5 conv taps are
    # built in-kernel (no 5x im2col expansion in HBM).
    x_tc = jnp.transpose(x, (0, 2, 1))                               # (B, T, CIN)
    x_hal = jnp.pad(x_tc, ((0, 0), (PAD, PAD), (0, 0))).astype(bf16)

    # conv1 weight flattened to (K*CIN, COUT_P) with the 1x1 residual conv
    # embedded at the centre tap, concatenated along output lanes.
    w1_flat = jnp.pad(params["w1"].reshape(KC, COUT), ((0, 0), (0, pad_c)))
    wr_exp = jnp.zeros((KC, COUT_P), f32).at[
        PAD * CIN:(PAD + 1) * CIN, :COUT].set(params["wr"])
    wa = jnp.concatenate([w1_flat, wr_exp], axis=1).astype(bf16)     # (KC, 2C)

    w2_flat = jnp.pad(params["w2"], ((0, 0), (0, pad_c), (0, pad_c))
                      ).reshape(KSIZE * COUT_P, COUT_P).astype(bf16)

    # cond encoder (Mish -> Linear) as one batched XLA GEMM, per-batch rows.
    embed = _mish_ref(cond) @ params["lw"] + params["lb"]            # (B, COUT)
    embed = jnp.pad(embed, ((0, 0), (0, pad_c))).reshape(B, 1, COUT_P).astype(f32)

    # Group indicator matrices; padded channels get all-zero rows/cols.
    ch = jnp.arange(COUT_P)
    gmat = ((ch[:, None] // cpg == jnp.arange(NGROUPS)[None, :])
            & (ch[:, None] < COUT)).astype(f32)                      # (C, G)
    gmat_scaled = gmat / float(T * cpg)
    gmat_t = gmat.T                                                  # (G, C)

    def padrow(v):
        return jnp.pad(v, ((0, 0), (0, pad_c)))

    pvec = jnp.concatenate(
        [padrow(params[k]) for k in
         ("b1", "g1w", "g1b", "b2", "g2w", "g2b", "br")] + [gmat_t],
        axis=0).astype(f32)                                          # (7+G, C)

    def const_spec(shape):
        zeros = (0,) * len(shape)
        return pl.BlockSpec(shape, lambda b, _z=zeros: _z)

    in_specs = [
        pl.BlockSpec((1, T + 2 * PAD, CIN), lambda b: (b, 0, 0)),    # halo'd x
        pl.BlockSpec((1, 1, COUT_P), lambda b: (b, 0, 0)),           # cond embed
        const_spec((KC, 2 * COUT_P)),                                # conv1 + res W
        const_spec((KSIZE * COUT_P, COUT_P)),                        # conv2 W
        const_spec((7 + NGROUPS, COUT_P)),                           # param rows
        const_spec((COUT_P, NGROUPS)),                               # scaled indicator
    ]

    # VMEM budget: double-buffered per-batch I/O blocks + (double-buffered)
    # grid-invariant weights + in-kernel intermediates; capped at 56 MiB for
    # Mosaic internal-scratch headroom below v7x's 64 MiB.
    act = T * COUT_P * 4
    io_blk = (T + 2 * PAD) * CIN * 2 + COUT_P * 4 + COUT_P * T * 4
    wgt = (KC * 2 * COUT_P * 2 + KSIZE * COUT_P * COUT_P * 2
           + (7 + NGROUPS) * COUT_P * 4 + COUT_P * NGROUPS * 4)
    interm = 12 * act   # both(2x), acc1/h/h2, bf16 halo, GN/Mish temps, transposes
    vmem_limit = int(min(max(2 * io_blk + 2 * wgt + interm + (4 << 20),
                             32 << 20), 56 << 20))

    out = pl.pallas_call(
        resblock_kernel,
        out_shape=jax.ShapeDtypeStruct((B, COUT_P, T), jnp.float32),
        grid=(B,),
        in_specs=in_specs,
        out_specs=pl.BlockSpec((1, COUT_P, T), lambda b: (b, 0, 0)),
        compiler_params=pltpu.CompilerParams(
            dimension_semantics=("parallel",),
            vmem_limit_bytes=vmem_limit),
    )(x_hal, embed, wa, w2_flat, pvec, gmat_scaled)

    # Output is already NCW; just strip the channel padding (no-op when COUT
    # is already a multiple of 128).
    return out[:, :COUT, :]


def resblock_reference(x, cond, params):
    """Pure-JAX f32 reference with identical math for validation."""
    x_tc = jnp.transpose(x, (0, 2, 1))  # (B, T, CIN)

    def conv_block(h, w, b, gw, gb):
        B, T, _ = h.shape
        C = w.shape[2]
        cpg = C // NGROUPS
        hp = jnp.pad(h, ((0, 0), (PAD, PAD), (0, 0)))
        out = b
        for k in range(KSIZE):
            out = out + jnp.einsum("btc,cd->btd", hp[:, k:k + T, :], w[k])
        g = out.reshape(B, T, NGROUPS, cpg)
        mean = g.mean(axis=(1, 3), keepdims=True)
        var = ((g - mean) ** 2).mean(axis=(1, 3), keepdims=True)
        gn = ((g - mean) / jnp.sqrt(var + EPS)).reshape(B, T, C) * gw + gb
        return _mish_ref(gn)

    h1 = conv_block(x_tc, params["w1"], params["b1"], params["g1w"], params["g1b"])
    embed = _mish_ref(cond) @ params["lw"] + params["lb"]            # (B, COUT)
    h = h1 + embed[:, None, :]
    h2 = conv_block(h, params["w2"], params["b2"], params["g2w"], params["g2b"])
    res = jnp.einsum("btc,cd->btd", x_tc, params["wr"]) + params["br"]
    return jnp.transpose(h2 + res, (0, 2, 1))


def make_params(key, cin, cout, cond_dim):
    ks = jax.random.split(key, 10)
    return {
        # conv weights stored as (K, Cin, Cout)  (torch layout is (Cout, Cin, K))
        "w1": jax.random.normal(ks[0], (KSIZE, cin, cout), jnp.float32) * 0.2,
        "b1": jax.random.normal(ks[1], (1, cout), jnp.float32) * 0.1,
        "g1w": 1.0 + 0.1 * jax.random.normal(ks[2], (1, cout), jnp.float32),
        "g1b": 0.1 * jax.random.normal(ks[3], (1, cout), jnp.float32),
        "lw": jax.random.normal(ks[4], (cond_dim, cout), jnp.float32) * 0.2,
        "lb": jax.random.normal(ks[5], (1, cout), jnp.float32) * 0.1,
        "w2": jax.random.normal(ks[6], (KSIZE, cout, cout), jnp.float32) * 0.2,
        "b2": jax.random.normal(ks[7], (1, cout), jnp.float32) * 0.1,
        "g2w": 1.0 + 0.1 * jax.random.normal(ks[8], (1, cout), jnp.float32),
        "g2b": 0.1 * jax.random.normal(ks[9], (1, cout), jnp.float32),
        # residual 1x1 conv (in_channels != out_channels branch)
        "wr": jax.random.normal(jax.random.fold_in(key, 100), (cin, cout), jnp.float32) * 0.2,
        "br": jax.random.normal(jax.random.fold_in(key, 101), (1, cout), jnp.float32) * 0.1,
    }


if __name__ == "__main__":
    B, CIN, COUT, T, COND_DIM = 2, 4, 16, 16, 8   # COUT divisible by 8 (GroupNorm)

    key = jax.random.PRNGKey(0)
    kx, kc, kp = jax.random.split(key, 3)
    x = jax.random.normal(kx, (B, CIN, T), jnp.float32)
    cond = jax.random.normal(kc, (B, COND_DIM), jnp.float32)
    params = make_params(kp, CIN, COUT, COND_DIM)

    out = resblock_forward(x, cond, params)
    out = jax.block_until_ready(out)

    ref = resblock_reference(x, cond, params)
    assert out.shape == (B, COUT, T), out.shape
    max_err = float(jnp.max(jnp.abs(out - ref)))
    assert max_err < 5e-2, f"max abs error too large: {max_err}"

    print("KERNEL_OK")
</pallas_src>

<mosaic_0001>
module attributes {stable_mosaic.version = 11 : i64} {
  func.func @resblock_kernel(%arg0: i32, %arg1: memref<1x20x4xbf16, #tpu.memory_space<vmem>>, %arg2: memref<1x1x128xf32, #tpu.memory_space<vmem>>, %arg3: memref<20x256xbf16, #tpu.memory_space<vmem>>, %arg4: memref<640x128xbf16, #tpu.memory_space<vmem>>, %arg5: memref<15x128xf32, #tpu.memory_space<vmem>>, %arg6: memref<128x8xf32, #tpu.memory_space<vmem>>, %arg7: memref<1x128x16xf32, #tpu.memory_space<vmem>>) attributes {dimension_semantics = [#tpu.dimension_semantics<parallel>], iteration_bounds = array<i64: 2>, scalar_prefetch = 0 : i64, scratch_operands = 0 : i64, tpu.core_type = #tpu.core_type<tc>, window_params = [{transform_indices = @transform_0, window_bounds = array<i64: 1, 20, 4>}, {transform_indices = @transform_1, window_bounds = array<i64: 1, 1, 128>}, {pipeline_mode = #tpu.pipeline_mode<synchronous>, transform_indices = @transform_2, window_bounds = array<i64: 20, 256>}, {pipeline_mode = #tpu.pipeline_mode<synchronous>, transform_indices = @transform_3, window_bounds = array<i64: 640, 128>}, {pipeline_mode = #tpu.pipeline_mode<synchronous>, transform_indices = @transform_4, window_bounds = array<i64: 15, 128>}, {pipeline_mode = #tpu.pipeline_mode<synchronous>, transform_indices = @transform_5, window_bounds = array<i64: 128, 8>}, {transform_indices = @transform_6, window_bounds = array<i64: 1, 128, 16>}]} {
    %c0 = arith.constant 0 : index
    %c0_0 = arith.constant 0 : index
    %0 = vector.load %arg5[%c0, %c0_0] : memref<15x128xf32, #tpu.memory_space<vmem>>, vector<1x128xf32>
    %c1 = arith.constant 1 : index
    %c0_1 = arith.constant 0 : index
    %1 = vector.load %arg5[%c1, %c0_1] : memref<15x128xf32, #tpu.memory_space<vmem>>, vector<1x128xf32>
    %c2 = arith.constant 2 : index
    %c0_2 = arith.constant 0 : index
    %2 = vector.load %arg5[%c2, %c0_2] : memref<15x128xf32, #tpu.memory_space<vmem>>, vector<1x128xf32>
    %c3 = arith.constant 3 : index
    %c0_3 = arith.constant 0 : index
    %3 = vector.load %arg5[%c3, %c0_3] : memref<15x128xf32, #tpu.memory_space<vmem>>, vector<1x128xf32>
    %c4 = arith.constant 4 : index
    %c0_4 = arith.constant 0 : index
    %4 = vector.load %arg5[%c4, %c0_4] : memref<15x128xf32, #tpu.memory_space<vmem>>, vector<1x128xf32>
    %c5 = arith.constant 5 : index
    %c0_5 = arith.constant 0 : index
    %5 = vector.load %arg5[%c5, %c0_5] : memref<15x128xf32, #tpu.memory_space<vmem>>, vector<1x128xf32>
    %c6 = arith.constant 6 : index
    %c0_6 = arith.constant 0 : index
    %6 = vector.load %arg5[%c6, %c0_6] : memref<15x128xf32, #tpu.memory_space<vmem>>, vector<1x128xf32>
    %c7 = arith.constant 7 : index
    %c0_7 = arith.constant 0 : index
    %7 = vector.load %arg5[%c7, %c0_7] : memref<15x128xf32, #tpu.memory_space<vmem>>, vector<8x128xf32>
    %c0_8 = arith.constant 0 : index
    %c0_9 = arith.constant 0 : index
    %8 = vector.load %arg6[%c0_8, %c0_9] : memref<128x8xf32, #tpu.memory_space<vmem>>, vector<128x8xf32>
    %c0_10 = arith.constant 0 : index
    %c0_11 = arith.constant 0 : index
    %c0_12 = arith.constant 0 : index
    %9 = vector.load %arg1[%c0_10, %c0_11, %c0_12] : memref<1x20x4xbf16, #tpu.memory_space<vmem>>, vector<1x20x4xbf16>
    %10 = vector.shape_cast %9 : vector<1x20x4xbf16> to vector<20x4xbf16>
    %11 = vector.extract_strided_slice %10 {offsets = [0, 0], sizes = [16, 4], strides = [1, 1]} : vector<20x4xbf16> to vector<16x4xbf16>
    %c0_13 = arith.constant 0 : index
    %c0_14 = arith.constant 0 : index
    %12 = vector.load %arg3[%c0_13, %c0_14] : memref<20x256xbf16, #tpu.memory_space<vmem>>, vector<4x256xbf16>
    %cst = arith.constant dense<0.000000e+00> : vector<16x256xf32>
    %13 = tpu.matmul %11, %12, %cst {dimension_numbers = #tpu.dot_dimension_numbers<[1], [0], [0], [1], [0, 0, 1, 1], [], []>} : vector<16x4xbf16>, vector<4x256xbf16>, vector<16x256xf32> -> vector<16x256xf32>
    %14 = vector.extract_strided_slice %10 {offsets = [1, 0], sizes = [16, 4], strides = [1, 1]} : vector<20x4xbf16> to vector<16x4xbf16>
    %c4_15 = arith.constant 4 : index
    %c0_16 = arith.constant 0 : index
    %15 = vector.load %arg3[%c4_15, %c0_16] : memref<20x256xbf16, #tpu.memory_space<vmem>>, vector<4x256xbf16>
    %cst_17 = arith.constant dense<0.000000e+00> : vector<16x256xf32>
    %16 = tpu.matmul %14, %15, %cst_17 {dimension_numbers = #tpu.dot_dimension_numbers<[1], [0], [0], [1], [0, 0, 1, 1], [], []>} : vector<16x4xbf16>, vector<4x256xbf16>, vector<16x256xf32> -> vector<16x256xf32>
    %17 = arith.addf %13, %16 : vector<16x256xf32>
    %18 = vector.extract_strided_slice %10 {offsets = [2, 0], sizes = [16, 4], strides = [1, 1]} : vector<20x4xbf16> to vector<16x4xbf16>
    %c8 = arith.constant 8 : index
    %c0_18 = arith.constant 0 : index
    %19 = vector.load %arg3[%c8, %c0_18] : memref<20x256xbf16, #tpu.memory_space<vmem>>, vector<4x256xbf16>
    %cst_19 = arith.constant dense<0.000000e+00> : vector<16x256xf32>
    %20 = tpu.matmul %18, %19, %cst_19 {dimension_numbers = #tpu.dot_dimension_numbers<[1], [0], [0], [1], [0, 0, 1, 1], [], []>} : vector<16x4xbf16>, vector<4x256xbf16>, vector<16x256xf32> -> vector<16x256xf32>
    %21 = arith.addf %17, %20 : vector<16x256xf32>
    %22 = vector.extract_strided_slice %10 {offsets = [3, 0], sizes = [16, 4], strides = [1, 1]} : vector<20x4xbf16> to vector<16x4xbf16>
    %c12 = arith.constant 12 : index
    %c0_20 = arith.constant 0 : index
    %23 = vector.load %arg3[%c12, %c0_20] : memref<20x256xbf16, #tpu.memory_space<vmem>>, vector<4x256xbf16>
    %cst_21 = arith.constant dense<0.000000e+00> : vector<16x256xf32>
    %24 = tpu.matmul %22, %23, %cst_21 {dimension_numbers = #tpu.dot_dimension_numbers<[1], [0], [0], [1], [0, 0, 1, 1], [], []>} : vector<16x4xbf16>, vector<4x256xbf16>, vector<16x256xf32> -> vector<16x256xf32>
    %25 = arith.addf %21, %24 : vector<16x256xf32>
    %26 = vector.extract_strided_slice %10 {offsets = [4, 0], sizes = [16, 4], strides = [1, 1]} : vector<20x4xbf16> to vector<16x4xbf16>
    %c16 = arith.constant 16 : index
    %c0_22 = arith.constant 0 : index
    %27 = vector.load %arg3[%c16, %c0_22] : memref<20x256xbf16, #tpu.memory_space<vmem>>, vector<4x256xbf16>
    %cst_23 = arith.constant dense<0.000000e+00> : vector<16x256xf32>
    %28 = tpu.matmul %26, %27, %cst_23 {dimension_numbers = #tpu.dot_dimension_numbers<[1], [0], [0], [1], [0, 0, 1, 1], [], []>} : vector<16x4xbf16>, vector<4x256xbf16>, vector<16x256xf32> -> vector<16x256xf32>
    %29 = arith.addf %25, %28 : vector<16x256xf32>
    %30 = vector.extract_strided_slice %29 {offsets = [0, 128], sizes = [16, 128], strides = [1, 1]} : vector<16x256xf32> to vector<16x128xf32>
    %31 = vector.broadcast %6 : vector<1x128xf32> to vector<16x128xf32>
    %32 = arith.addf %30, %31 : vector<16x128xf32>
    %33 = tpu.transpose %32, [1, 0] : vector<16x128xf32> -> vector<128x16xf32>
    %c0_24 = arith.constant 0 : index
    %c0_25 = arith.constant 0 : index
    %c0_26 = arith.constant 0 : index
    %34 = vector.load %arg7[%c0_24, %c0_25, %c0_26] : memref<1x128x16xf32, #tpu.memory_space<vmem>>, vector<1x128x16xf32>
    %35 = vector.shape_cast %34 : vector<1x128x16xf32> to vector<128x16xf32>
    %36 = vector.shape_cast %33 : vector<128x16xf32> to vector<1x128x16xf32>
    tpu.vector_store %arg7[%c0_24, %c0_25, %c0_26], %36 {strides = array<i32>} : memref<1x128x16xf32, #tpu.memory_space<vmem>>, vector<1x128x16xf32>,
    %37 = vector.extract_strided_slice %29 {offsets = [0, 0], sizes = [16, 128], strides = [1, 1]} : vector<16x256xf32> to vector<16x128xf32>
    %38 = vector.broadcast %0 : vector<1x128xf32> to vector<16x128xf32>
    %39 = arith.addf %37, %38 : vector<16x128xf32>
    %cst_27 = arith.constant dense<0.000000e+00> : vector<128xf32>
    %40 = vector.multi_reduction <add>, %39, %cst_27 [0] : vector<16x128xf32> to vector<128xf32>
    %41 = vector.shape_cast %40 : vector<128xf32> to vector<1x128xf32>
    %42 = arith.mulf %39, %39 : vector<16x128xf32>
    %cst_28 = arith.constant dense<0.000000e+00> : vector<128xf32>
    %43 = vector.multi_reduction <add>, %42, %cst_28 [0] : vector<16x128xf32> to vector<128xf32>
    %44 = vector.shape_cast %43 : vector<128xf32> to vector<1x128xf32>
    %45 = tpu.concatenate %41, %44 in 0 : vector<1x128xf32>, vector<1x128xf32> -> vector<2x128xf32>
    %cst_29 = arith.constant dense<0.000000e+00> : vector<2x8xf32>
    %46 = tpu.matmul %45, %8, %cst_29 {dimension_numbers = #tpu.dot_dimension_numbers<[1], [0], [0], [1], [0, 0, 1, 1], [], []>} : vector<2x128xf32>, vector<128x8xf32>, vector<2x8xf32> -> vector<2x8xf32>
    %47 = vector.extract_strided_slice %46 {offsets = [0, 0], sizes = [1, 8], strides = [1, 1]} : vector<2x8xf32> to vector<1x8xf32>
    %48 = vector.extract_strided_slice %46 {offsets = [1, 0], sizes = [1, 8], strides = [1, 1]} : vector<2x8xf32> to vector<1x8xf32>
    %49 = arith.mulf %47, %47 : vector<1x8xf32>
    %50 = arith.subf %48, %49 : vector<1x8xf32>
    %cst_30 = arith.constant 0.000000e+00 : f32
    %51 = vector.broadcast %cst_30 : f32 to vector<1x8xf32>
    %52 = arith.maximumf %50, %51 : vector<1x8xf32>
    %53 = tpu.concatenate %47, %52 in 0 : vector<1x8xf32>, vector<1x8xf32> -> vector<2x8xf32>
    %cst_31 = arith.constant dense<0.000000e+00> : vector<2x128xf32>
    %54 = tpu.matmul %53, %7, %cst_31 {dimension_numbers = #tpu.dot_dimension_numbers<[1], [0], [0], [1], [0, 0, 1, 1], [], []>} : vector<2x8xf32>, vector<8x128xf32>, vector<2x128xf32> -> vector<2x128xf32>
    %55 = vector.extract_strided_slice %54 {offsets = [0, 0], sizes = [1, 128], strides = [1, 1]} : vector<2x128xf32> to vector<1x128xf32>
    %56 = vector.extract_strided_slice %54 {offsets = [1, 0], sizes = [1, 128], strides = [1, 1]} : vector<2x128xf32> to vector<1x128xf32>
    %57 = vector.broadcast %55 : vector<1x128xf32> to vector<16x128xf32>
    %58 = arith.subf %39, %57 : vector<16x128xf32>
    %cst_32 = arith.constant 9.99999974E-6 : f32
    %59 = vector.broadcast %cst_32 : f32 to vector<1x128xf32>
    %60 = arith.addf %56, %59 : vector<1x128xf32>
    %61 = math.rsqrt %60 : vector<1x128xf32>
    %62 = vector.broadcast %61 : vector<1x128xf32> to vector<16x128xf32>
    %63 = arith.mulf %58, %62 : vector<16x128xf32>
    %64 = vector.broadcast %1 : vector<1x128xf32> to vector<16x128xf32>
    %65 = arith.mulf %63, %64 : vector<16x128xf32>
    %66 = vector.broadcast %2 : vector<1x128xf32> to vector<16x128xf32>
    %67 = arith.addf %65, %66 : vector<16x128xf32>
    %cst_33 = arith.constant 2.000000e+01 : f32
    %68 = vector.broadcast %cst_33 : f32 to vector<16x128xf32>
    %69 = arith.minimumf %67, %68 : vector<16x128xf32>
    %70 = math.exp %69 : vector<16x128xf32>
    %cst_34 = arith.constant 2.000000e+00 : f32
    %71 = vector.broadcast %cst_34 : f32 to vector<16x128xf32>
    %72 = arith.addf %70, %71 : vector<16x128xf32>
    %73 = arith.mulf %70, %72 : vector<16x128xf32>
    %74 = arith.mulf %67, %73 : vector<16x128xf32>
    %cst_35 = arith.constant 2.000000e+00 : f32
    %75 = vector.broadcast %cst_35 : f32 to vector<16x128xf32>
    %76 = arith.addf %73, %75 : vector<16x128xf32>
    %77 = tpu.reciprocal %76 {approx = true} : vector<16x128xf32> -> vector<16x128xf32>
    %78 = arith.mulf %74, %77 : vector<16x128xf32>
    %c0_36 = arith.constant 0 : index
    %c0_37 = arith.constant 0 : index
    %c0_38 = arith.constant 0 : index
    %79 = vector.load %arg2[%c0_36, %c0_37, %c0_38] : memref<1x1x128xf32, #tpu.memory_space<vmem>>, vector<1x1x128xf32>
    %80 = vector.shape_cast %79 : vector<1x1x128xf32> to vector<1x128xf32>
    %81 = vector.broadcast %80 : vector<1x128xf32> to vector<16x128xf32>
    %82 = arith.addf %78, %81 : vector<16x128xf32>
    %83 = arith.truncf %82 : vector<16x128xf32> to vector<16x128xbf16>
    %cst_39 = arith.constant 0.000000e+00 : bf16
    %84 = vector.broadcast %cst_39 : bf16 to vector<2x128xbf16>
    %85 = tpu.concatenate %84, %83, %84 in 0 : vector<2x128xbf16>, vector<16x128xbf16>, vector<2x128xbf16> -> vector<20x128xbf16>
    %86 = vector.extract_strided_slice %85 {offsets = [0, 0], sizes = [16, 128], strides = [1, 1]} : vector<20x128xbf16> to vector<16x128xbf16>
    %c0_40 = arith.constant 0 : index
    %c0_41 = arith.constant 0 : index
    %87 = vector.load %arg4[%c0_40, %c0_41] : memref<640x128xbf16, #tpu.memory_space<vmem>>, vector<128x128xbf16>
    %cst_42 = arith.constant dense<0.000000e+00> : vector<16x128xf32>
    %88 = tpu.matmul %86, %87, %cst_42 {dimension_numbers = #tpu.dot_dimension_numbers<[1], [0], [0], [1], [0, 0, 1, 1], [], []>} : vector<16x128xbf16>, vector<128x128xbf16>, vector<16x128xf32> -> vector<16x128xf32>
    %89 = vector.broadcast %3 : vector<1x128xf32> to vector<16x128xf32>
    %90 = arith.addf %89, %88 : vector<16x128xf32>
    %91 = vector.extract_strided_slice %85 {offsets = [1, 0], sizes = [16, 128], strides = [1, 1]} : vector<20x128xbf16> to vector<16x128xbf16>
    %c128 = arith.constant 128 : index
    %c0_43 = arith.constant 0 : index
    %92 = vector.load %arg4[%c128, %c0_43] : memref<640x128xbf16, #tpu.memory_space<vmem>>, vector<128x128xbf16>
    %cst_44 = arith.constant dense<0.000000e+00> : vector<16x128xf32>
    %93 = tpu.matmul %91, %92, %cst_44 {dimension_numbers = #tpu.dot_dimension_numbers<[1], [0], [0], [1], [0, 0, 1, 1], [], []>} : vector<16x128xbf16>, vector<128x128xbf16>, vector<16x128xf32> -> vector<16x128xf32>
    %94 = arith.addf %90, %93 : vector<16x128xf32>
    %95 = vector.extract_strided_slice %85 {offsets = [2, 0], sizes = [16, 128], strides = [1, 1]} : vector<20x128xbf16> to vector<16x128xbf16>
    %c256 = arith.constant 256 : index
    %c0_45 = arith.constant 0 : index
    %96 = vector.load %arg4[%c256, %c0_45] : memref<640x128xbf16, #tpu.memory_space<vmem>>, vector<128x128xbf16>
    %cst_46 = arith.constant dense<0.000000e+00> : vector<16x128xf32>
    %97 = tpu.matmul %95, %96, %cst_46 {dimension_numbers = #tpu.dot_dimension_numbers<[1], [0], [0], [1], [0, 0, 1, 1], [], []>} : vector<16x128xbf16>, vector<128x128xbf16>, vector<16x128xf32> -> vector<16x128xf32>
    %98 = arith.addf %94, %97 : vector<16x128xf32>
    %99 = vector.extract_strided_slice %85 {offsets = [3, 0], sizes = [16, 128], strides = [1, 1]} : vector<20x128xbf16> to vector<16x128xbf16>
    %c384 = arith.constant 384 : index
    %c0_47 = arith.constant 0 : index
    %100 = vector.load %arg4[%c384, %c0_47] : memref<640x128xbf16, #tpu.memory_space<vmem>>, vector<128x128xbf16>
    %cst_48 = arith.constant dense<0.000000e+00> : vector<16x128xf32>
    %101 = tpu.matmul %99, %100, %cst_48 {dimension_numbers = #tpu.dot_dimension_numbers<[1], [0], [0], [1], [0, 0, 1, 1], [], []>} : vector<16x128xbf16>, vector<128x128xbf16>, vector<16x128xf32> -> vector<16x128xf32>
    %102 = arith.addf %98, %101 : vector<16x128xf32>
    %103 = vector.extract_strided_slice %85 {offsets = [4, 0], sizes = [16, 128], strides = [1, 1]} : vector<20x128xbf16> to vector<16x128xbf16>
    %c512 = arith.constant 512 : index
    %c0_49 = arith.constant 0 : index
    %104 = vector.load %arg4[%c512, %c0_49] : memref<640x128xbf16, #tpu.memory_space<vmem>>, vector<128x128xbf16>
    %cst_50 = arith.constant dense<0.000000e+00> : vector<16x128xf32>
    %105 = tpu.matmul %103, %104, %cst_50 {dimension_numbers = #tpu.dot_dimension_numbers<[1], [0], [0], [1], [0, 0, 1, 1], [], []>} : vector<16x128xbf16>, vector<128x128xbf16>, vector<16x128xf32> -> vector<16x128xf32>
    %106 = arith.addf %102, %105 : vector<16x128xf32>
    %cst_51 = arith.constant dense<0.000000e+00> : vector<128xf32>
    %107 = vector.multi_reduction <add>, %106, %cst_51 [0] : vector<16x128xf32> to vector<128xf32>
    %108 = vector.shape_cast %107 : vector<128xf32> to vector<1x128xf32>
    %109 = arith.mulf %106, %106 : vector<16x128xf32>
    %cst_52 = arith.constant dense<0.000000e+00> : vector<128xf32>
    %110 = vector.multi_reduction <add>, %109, %cst_52 [0] : vector<16x128xf32> to vector<128xf32>
    %111 = vector.shape_cast %110 : vector<128xf32> to vector<1x128xf32>
    %112 = tpu.concatenate %108, %111 in 0 : vector<1x128xf32>, vector<1x128xf32> -> vector<2x128xf32>
    %cst_53 = arith.constant dense<0.000000e+00> : vector<2x8xf32>
    %113 = tpu.matmul %112, %8, %cst_53 {dimension_numbers = #tpu.dot_dimension_numbers<[1], [0], [0], [1], [0, 0, 1, 1], [], []>} : vector<2x128xf32>, vector<128x8xf32>, vector<2x8xf32> -> vector<2x8xf32>
    %114 = vector.extract_strided_slice %113 {offsets = [0, 0], sizes = [1, 8], strides = [1, 1]} : vector<2x8xf32> to vector<1x8xf32>
    %115 = vector.extract_strided_slice %113 {offsets = [1, 0], sizes = [1, 8], strides = [1, 1]} : vector<2x8xf32> to vector<1x8xf32>
    %116 = arith.mulf %114, %114 : vector<1x8xf32>
    %117 = arith.subf %115, %116 : vector<1x8xf32>
    %cst_54 = arith.constant 0.000000e+00 : f32
    %118 = vector.broadcast %cst_54 : f32 to vector<1x8xf32>
    %119 = arith.maximumf %117, %118 : vector<1x8xf32>
    %120 = tpu.concatenate %114, %119 in 0 : vector<1x8xf32>, vector<1x8xf32> -> vector<2x8xf32>
    %cst_55 = arith.constant dense<0.000000e+00> : vector<2x128xf32>
    %121 = tpu.matmul %120, %7, %cst_55 {dimension_numbers = #tpu.dot_dimension_numbers<[1], [0], [0], [1], [0, 0, 1, 1], [], []>} : vector<2x8xf32>, vector<8x128xf32>, vector<2x128xf32> -> vector<2x128xf32>
    %122 = vector.extract_strided_slice %121 {offsets = [0, 0], sizes = [1, 128], strides = [1, 1]} : vector<2x128xf32> to vector<1x128xf32>
    %123 = vector.extract_strided_slice %121 {offsets = [1, 0], sizes = [1, 128], strides = [1, 1]} : vector<2x128xf32> to vector<1x128xf32>
    %124 = vector.broadcast %122 : vector<1x128xf32> to vector<16x128xf32>
    %125 = arith.subf %106, %124 : vector<16x128xf32>
    %cst_56 = arith.constant 9.99999974E-6 : f32
    %126 = vector.broadcast %cst_56 : f32 to vector<1x128xf32>
    %127 = arith.addf %123, %126 : vector<1x128xf32>
    %128 = math.rsqrt %127 : vector<1x128xf32>
    %129 = vector.broadcast %128 : vector<1x128xf32> to vector<16x128xf32>
    %130 = arith.mulf %125, %129 : vector<16x128xf32>
    %131 = vector.broadcast %4 : vector<1x128xf32> to vector<16x128xf32>
    %132 = arith.mulf %130, %131 : vector<16x128xf32>
    %133 = vector.broadcast %5 : vector<1x128xf32> to vector<16x128xf32>
    %134 = arith.addf %132, %133 : vector<16x128xf32>
    %cst_57 = arith.constant 2.000000e+01 : f32
    %135 = vector.broadcast %cst_57 : f32 to vector<16x128xf32>
    %136 = arith.minimumf %134, %135 : vector<16x128xf32>
    %137 = math.exp %136 : vector<16x128xf32>
    %cst_58 = arith.constant 2.000000e+00 : f32
    %138 = vector.broadcast %cst_58 : f32 to vector<16x128xf32>
    %139 = arith.addf %137, %138 : vector<16x128xf32>
    %140 = arith.mulf %137, %139 : vector<16x128xf32>
    %141 = arith.mulf %134, %140 : vector<16x128xf32>
    %cst_59 = arith.constant 2.000000e+00 : f32
    %142 = vector.broadcast %cst_59 : f32 to vector<16x128xf32>
    %143 = arith.addf %140, %142 : vector<16x128xf32>
    %144 = tpu.reciprocal %143 {approx = true} : vector<16x128xf32> -> vector<16x128xf32>
    %145 = arith.mulf %141, %144 : vector<16x128xf32>
    %c0_60 = arith.constant 0 : index
    %c0_61 = arith.constant 0 : index
    %c0_62 = arith.constant 0 : index
    %146 = vector.load %arg7[%c0_60, %c0_61, %c0_62] : memref<1x128x16xf32, #tpu.memory_space<vmem>>, vector<1x128x16xf32>
    %147 = vector.shape_cast %146 : vector<1x128x16xf32> to vector<128x16xf32>
    %148 = tpu.transpose %145, [1, 0] : vector<16x128xf32> -> vector<128x16xf32>
    %149 = arith.addf %147, %148 : vector<128x16xf32>
    %c0_63 = arith.constant 0 : index
    %c0_64 = arith.constant 0 : index
    %c0_65 = arith.constant 0 : index
    %150 = vector.load %arg7[%c0_63, %c0_64, %c0_65] : memref<1x128x16xf32, #tpu.memory_space<vmem>>, vector<1x128x16xf32>
    %151 = vector.shape_cast %150 : vector<1x128x16xf32> to vector<128x16xf32>
    %152 = vector.shape_cast %149 : vector<128x16xf32> to vector<1x128x16xf32>
    tpu.vector_store %arg7[%c0_63, %c0_64, %c0_65], %152 {strides = array<i32>} : memref<1x128x16xf32, #tpu.memory_space<vmem>>, vector<1x128x16xf32>,
    return
  }
  func.func @transform_0(%arg0: i32) -> (i32, i32, i32) {
    %c0_i32 = arith.constant 0 : i32
    %c0_i32_0 = arith.constant 0 : i32
    %c0_i32_1 = arith.constant 0 : i32
    return %arg0, %c0_i32, %c0_i32_0 : i32, i32, i32
  }
  func.func @transform_1(%arg0: i32) -> (i32, i32, i32) {
    %c0_i32 = arith.constant 0 : i32
    %c0_i32_0 = arith.constant 0 : i32
    %c0_i32_1 = arith.constant 0 : i32
    return %arg0, %c0_i32, %c0_i32_0 : i32, i32, i32
  }
  func.func @transform_2(%arg0: i32) -> (i32, i32) {
    %c0_i32 = arith.constant 0 : i32
    %c0_i32_0 = arith.constant 0 : i32
    %c0_i32_1 = arith.constant 0 : i32
    return %c0_i32, %c0_i32_0 : i32, i32
  }
  func.func @transform_3(%arg0: i32) -> (i32, i32) {
    %c0_i32 = arith.constant 0 : i32
    %c0_i32_0 = arith.constant 0 : i32
    %c0_i32_1 = arith.constant 0 : i32
    return %c0_i32, %c0_i32_0 : i32, i32
  }
  func.func @transform_4(%arg0: i32) -> (i32, i32) {
    %c0_i32 = arith.constant 0 : i32
    %c0_i32_0 = arith.constant 0 : i32
    %c0_i32_1 = arith.constant 0 : i32
    return %c0_i32, %c0_i32_0 : i32, i32
  }
  func.func @transform_5(%arg0: i32) -> (i32, i32) {
    %c0_i32 = arith.constant 0 : i32
    %c0_i32_0 = arith.constant 0 : i32
    %c0_i32_1 = arith.constant 0 : i32
    return %c0_i32, %c0_i32_0 : i32, i32
  }
  func.func @transform_6(%arg0: i32) -> (i32, i32, i32) {
    %c0_i32 = arith.constant 0 : i32
    %c0_i32_0 = arith.constant 0 : i32
    %c0_i32_1 = arith.constant 0 : i32
    return %arg0, %c0_i32, %c0_i32_0 : i32, i32, i32
  }
}

</mosaic_0001>

<bundles_post_ra>
// kernel: tpu_custom_call.1
= control target key start
LH: loop header
LB: loop body
LE: loop exit
PB: predicated region body
PF: predicated region fallthrough
CT: control target
= control target key end

     0   :  { %11 = vsyncpa [#allocation3], 0  ;;  %s2493_s21 = smov 0   ;;  %s2915_s0 = inlined_call_operand.vmem [shape: bf16[2,20,4], index: 0, kind: input, shape index: {}]   ;;  %s2916_s1 = inlined_call_operand.vmem [shape: f32[2,1,128], index: 1, kind: input, shape index: {}]   ;;  %s2917_s2 = inlined_call_operand.vmem [shape: bf16[20,256], index: 2, kind: input, shape index: {}]   ;;  %s2918_s3 = inlined_call_operand.hbm [shape: bf16[640,128], index: 3, kind: input, shape index: {}]   ;;  %s2919_s4 = inlined_call_operand.vmem [shape: f32[15,128], index: 4, kind: input, shape index: {}]   ;;  %s2920_s5 = inlined_call_operand.vmem [shape: f32[128,8], index: 5, kind: input, shape index: {}]   ;;  %s2921_s6 = inlined_call_operand.vmem [shape: f32[2,128,16], index: 6, kind: output, shape index: {}]  }
   0x1 LB: > { %s2499_s22 = sadd.s32 4294967295, %s2449_s21   ;;  %p1885_p0 = scmp.ge.s32.totalorder %s2449_s21, 1  ;;  %s2449_s21 = sphi %s2493_s21, %s17_s21  }
   0x2   : > { %p184_p1 = scmp.lt.s32.totalorder %s2449_s21, 3  ;;  %s2451_s23 = smov [#allocation2]  }
   0x3   : > { %s199_s24 = sshll.u32 %s2451_s23, 4  ;;  %p2922_p3 = scmp.eq.s32.totalorder %s2499_s22, 0  ;;  %s200_s24 = int_to_ptr.vmem [resolvable:$true] %s199_s24 }
   0x4   : > { %p2503_p2 = pnand %p1885_p0, %p184_p1  ;;  %s2411_s29 = scalar_lea.hbm %s2918_s3, 5120 }
   0x5   : > { %p2412_p6 = scmp.ne.s32.totalorder %s2918_s3, %s2411_s29  ;;  %p2418_p10 = scmp.lt.u32.totalorder %s2411_s29, %s2918_s3 }
   0x6   : > { %s2924_s25 = scalar_select %p2503_p2, 1, 0 }
   0x7   : > { %p2318_p4 = pneg %p2503_p2 }
   0x9   : > { %p2512_p5 = pnand %p2922_p3, %p2318_p4 }
   0xb   : > { %p2413_p7 = pneg %p2512_p5 }
   0xd   : > { %p2414_p8 = pnand %p2413_p7, %p2412_p6 }
   0xf   : > { %p2415_p9 = pneg %p2414_p8 }
  0x11   : > { %p2420_p11 = pnand %p2418_p10, %p2415_p9 }
  0x13   : > { %2423 = shalt.err (!%p2420_p11)
}
  0x14   : > { %s2424_s10 = scalar_lea.vmem %s200_s24, 5120  ;;  %p2432_p1 = scmp.lt.s32.totalorder %s200_s24, %s200_s24 }
  0x15   : > { %p2425_p12 = scmp.ne.s32.totalorder %s200_s24, %s2424_s10  ;;  %p2433_p4 = scmp.lt.s32.totalorder %s2424_s10, %s2424_s10 }
  0x17   : > { %p2427_p13 = pnand %p2425_p12, %p2413_p7  ;;  %p2434_p3 = por %p2433_p4, %p2432_p1 }
  0x19   : > { %p2428_p0 = pneg %p2427_p13 }
  0x1b   : > { %p2435_p2 = pnand %p2434_p3, %p2428_p0 }
  0x1d   : > { %2438 = shalt.err (!%p2435_p2)
}
  0x1e   : > { %s2452_s11 = smov 64   ;;  %s2453_s12 = smov 4  }
  0x1f   : > { %2321 = dma.hbm_to_vmem [thread:$0]  (!%p2512_p5), %s2918_s3, 5120, %s200_s24, [#allocation3], %s2452_s11, %s2452_s11, %s2453_s12  }
  0x20   : > { %p2926_p6 = scmp.ne.s32.totalorder %s2924_s25, 0 }
  0x21   : > { %p2927_p8 = scmp.eq.s32.totalorder (!%p2926_p6), %s2499_s22, 0 }
  0x22   : > { %235 = sbr.rel (%p2926_p6) target bundleno = 1813 (0x715), region = 44 }
  0x29   : > { %2444 = dma.done.wait (%p2927_p8), [#allocation3], 5120   ;;  %p2928_p7 = pmov %p2927_p8 }
  0x2a   : > { %p268_p2 = scmp.lt.s32.totalorder %s2499_s22, 1  ;;  %v2454_v0 = vmov 0   ;;  %v2455_v1 = vmov 0.0|0.0   ;;  %v310_v2 = vld [vmem:[%s2917_s2] sm:$0xcc]  ;;  %vm343_vm0 = vcmask 1041408  }
  0x2b   : > { %2446 = vsyncadd (%p2928_p7), [#allocation3], 4294962176  ;;  %382 = vmatprep.mubr.bf16.mxu0 %v2454_v0  ;;  %2233 = vmatprep.subr.bf16.mxu1 %v2455_v1  ;;  %v309_v3 = vld [vmem:[%s2917_s2] sm:$0x33]  ;;  %v1896_v4 = vcombine.high %v310_v2, %v310_v2  ;;  %v1895_v5 = vcombine.low %v310_v2, %v310_v2  ;;  %v449_v10 = vld [vmem:[%s2917_s2 + $0x8] sm:$0x33] }
  0x2c   : > { %s2930_s22 = smov (!%p268_p2, %s2499_s22), 1  ;;  %v1900_v7 = vcombine.high %v309_v3, %v309_v3  ;;  %v1899_v9 = vcombine.low %v309_v3, %v309_v3  ;;  %v515_v15 = vld [vmem:[%s2917_s2 + $0x8] sm:$0xcc]  ;;  %vm339_vm1 = vcmask 31744   ;;  %vm319_vm2 = vsmask.f32 7424 }
  0x2d   : > { %s2313_s15 = smul.u32 12, %s2930_s22  ;;  %v338_v11 = vrot.slane %v1896_v4, 2  ;;  %v337_v12 = vrot.slane %v1895_v5, 2  ;;  %v1903_v20 = vcombine.low %v449_v10, %v449_v10  ;;  %v1908_v21 = vcombine.high %v515_v15, %v515_v15  ;;  %v290_v22 = vld [vmem:[%s2920_s5] sm:$0xff]  ;;  %v291_v26 = vld [vmem:[%s2920_s5 + $0x8] sm:$0xff]  ;;  %v292_v29 = vld [vmem:[%s2920_s5 + $0x10] sm:$0xff]  ;;  %s275_s7 = scalar_lea.vmem %s2916_s1, %s2930_s22 }
  0x2e   : > { %v401_v24 = vsel %vm343_vm0, %v1899_v9, 0  ;;  %v1907_v25 = vcombine.low %v515_v15, %v515_v15  ;;  %v1904_v28 = vcombine.high %v449_v10, %v449_v10  ;;  %v293_v30 = vld [vmem:[%s2920_s5 + $0x18] sm:$0xff]  ;;  %v2591_v40 = vpack.c.bf16 %v291_v26, %v290_v22  ;;  %v294_v41 = vld [vmem:[%s2920_s5 + $0x20] sm:$0xff]  ;;  %v295_v42 = vld [vmem:[%s2920_s5 + $0x28] sm:$0xff]  ;;  %s1969_s10 = sshll.u32 %s2930_s22, 7 }
  0x2f   : > { %s272_s18 = scalar_lea.vmem %s2915_s0, %s2313_s15  ;;  %1897 = vmatprep.subr.msk.bf16.mxu0 %vm343_vm0, %v338_v11  ;;  %v345_v17 = vsel %vm343_vm0, %v337_v12, 0  ;;  %v463_v34 = vsel %vm343_vm0, %v1903_v20, 0  ;;  %v532_v35 = vrot.slane %v1908_v21, 2  ;;  %v2601_v43 = vpack.c.bf16 %v293_v30, %v292_v29  ;;  %v589_v45 = vld [vmem:[%s2917_s2 + $0x10] sm:$0x33]  ;;  %v297_v59 = vld [vmem:[%s2920_s5 + $0x38] sm:$0xff]  ;;  %s2820_s13 = scalar_lea.vmem %s2921_s6, %s1969_s10 }
  0x30   : > { %v2554_v6 = vld [vmem:[%s272_s18] sm:$0xff]   ;;  %v2556_v8 = vld [vmem:[%s272_s18 + $0x8] ss:$0 sps:$4 sm:$0x33]   ;;  %351 = vmatpush1.bf16.msra.mxu0 %v345_v17  ;;  %v531_v33 = vrot.slane %v1907_v25, 2  ;;  %2235 = vmatpush3.bf16.msra.mxu1 %v2591_v40  ;;  %v2605_v44 = vpack.c.bf16 %v295_v42, %v294_v41  ;;  %vm450_vm3 = vcmask 1046528   ;;  %v1912_v47 = vcombine.high %v589_v45, %v589_v45 }
  0x31   : > { %v321_v13 = vshrl.u32 %v2554_v6, 16  ;;  %v323_v14 = vshll.u32 %v2554_v6, 16  ;;  %v328_v16 = vshll.u32 %v2556_v8, 16  ;;  %1901 = vmatprep.subr.msk.bf16.mxu0 %vm343_vm0, %v1900_v7  ;;  %v451_v36 = vrot.slane %v2554_v6, 1  ;;  %2236 = vmatprep.subr.bf16.mxu1 %v2455_v1  ;;  %v296_v58 = vld [vmem:[%s2920_s5 + $0x30] sm:$0xff]  ;;  %v298_v61 = vld [vmem:[%s2920_s5 + $0x40] sm:$0xff] }
  0x32   : > { %v452_v37 = vrot.slane %v2556_v8, 1  ;;  %v537_v38 = vsel %vm343_vm0, %v531_v33, 0  ;;  %v520_v39 = vshrl.u32 %v2556_v8, 16  ;;  %vm516_vm4 = vsmask.f32 6400  ;;  %v299_v62 = vld [vmem:[%s2920_s5 + $0x48] sm:$0xff] }
  0x33   : > { %v325_v18 = vrot.slane %v323_v14, 1  ;;  %v330_v19 = vrot.slane %v328_v16, 1  ;;  %v517_v27 = vrot.slane %v321_v13, 1  ;;  %v523_v32 = vrot.slane %v328_v16, 2  ;;  %v301_v2 = vld [vmem:[%s2920_s5 + $0x58] sm:$0xff]  ;;  %v302_v4 = vld [vmem:[%s2920_s5 + $0x60] sm:$0xff] }
  0x34   : > { %2238 = vmatpush3.bf16.msra.mxu1 %v2601_v43  ;;  %v453_v46 = vsel %vm450_vm3, %v451_v36, %v452_v37  ;;  %v518_v48 = vrot.slane %v323_v14, 2  ;;  %v522_v49 = vrot.slane %v520_v39, 1  ;;  %v1911_v52 = vcombine.low %v589_v45, %v589_v45  ;;  %v303_v5 = vld [vmem:[%s2920_s5 + $0x68] sm:$0xff]  ;;  %v304_v7 = vld [vmem:[%s2920_s5 + $0x70] sm:$0xff]  ;;  %v1916_v11 = vld [vmem:[%s2919_s4] ss:$0 sm:$0xff] }
  0x35   : > { %v326_v23 = vor.u32 %v325_v18, %v321_v13  ;;  %2239 = vmatprep.subr.bf16.mxu1 %v2455_v1  ;;  %v591_v55 = vrot.slane %v2554_v6, 2  ;;  %v592_v56 = vrot.slane %v2556_v8, 2  ;;  %vm590_vm5 = vcmask 1045504   ;;  %v305_v8 = vld [vmem:[%s2920_s5 + $0x78] sm:$0xff]  ;;  %v1915_v12 = vld [vmem:[%s2919_s4 + $0x6] ss:$0 sm:$0xff] }
  0x36   : > { %v519_v50 = vor.u32 %v518_v48, %v517_v27  ;;  %v524_v51 = vor.u32 %v523_v32, %v522_v49  ;;  %v603_v54 = vsel %vm343_vm0, %v1911_v52, 0  ;;  %v2635_v60 = vpack.c.bf16 %v297_v59, %v296_v58  ;;  %v2351_v49 = vld [vmem:[#allocation2] sm:$0xff]   ;;  %v2354_v52 = vld [vmem:[#allocation2 + $0x10] sm:$0xff]   ;;  %v2360_v58 = vld [vmem:[#allocation2 + $0x28] sm:$0xff]  }
  0x37   : > { %v331_v31 = vsel %vm319_vm2, %v326_v23, %v330_v19  ;;  %v593_v57 = vsel %vm590_vm5, %v591_v55, %v592_v56  ;;  %v2645_v63 = vpack.c.bf16 %v299_v62, %v298_v61  ;;  %vm2456_vm6 = vmmov 0   ;;  %v2357_v55 = vld [vmem:[#allocation2 + $0x90] sm:$0xff]   ;;  %v2358_v56 = vld [vmem:[#allocation2 + $0x20] sm:$0xff]   ;;  %v2363_v62 = vld [vmem:[#allocation2 + $0xa8] sm:$0xff]  }
  0x38   : > { %1898 = vmatmul.mubr.msk.bf16.vlgmr.msra.gmra.mrb[0].mxu0 %vm339_vm1, %v331_v31  ;;  %2241 = vmatpush3.bf16.msra.mxu1 %v2605_v44  ;;  %v525_v53 = vsel %vm516_vm4, %v519_v50, %v524_v51  ;;  %v2457_v9 = vmov 0.0   ;;  %v2679_v10 = vpack.c.bf16 %v305_v8, %v304_v7  ;;  %vm732_vm7 = vcmask 1040384   ;;  %v2352_v50 = vld [vmem:[#allocation2 + $0x8] sm:$0xff]   ;;  %v2353_v51 = vld [vmem:[#allocation2 + $0x80] sm:$0xff]   ;;  %v2362_v61 = vld [vmem:[#allocation2 + $0x30] sm:$0xff]  }
  0x39   : > { %407 = vmatpush1.bf16.msra.mxu0 %v401_v24  ;;  %438 = vmatprep.mubr.bf16.mxu0 %v2454_v0  ;;  %vm811_vm8 = vcmask 64512   ;;  %v2361_v59 = vld [vmem:[#allocation2 + $0xa0] sm:$0xff]   ;;  %vm1929_vm9 = vmneg %vm732_vm7  ;;  %vm693_vm10 = vcmask 130048  }
  0x3a   : > { %1905 = vmatprep.subr.msk.bf16.mxu0 %vm343_vm0, %v1904_v28  ;;  %2242 = vmatprep.subr.bf16.mxu1 %v2455_v1 }
  0x3b   : > { %2085 = vmatprep.mubr.msk.f32.mxu1 %vm2456_vm6, %v2457_v9 }
  0x3c   : > { %2244 = vmatpush3.bf16.msra.mxu1 %v2635_v60 }
  0x3d   : > { %2245 = vmatprep.subr.bf16.mxu1 %v2455_v1 }
  0x40   : > { %2247 = vmatpush3.bf16.msra.mxu1 %v2645_v63 }
  0x41   : > { %2248 = vmatprep.subr.bf16.mxu1 %v2455_v1 }
  0x44   : > { %1902 = vmatmul.mubr.msk.bf16.vlgmr.msra.gmra.mrb[0].mxu0 %vm339_vm1, %v2554_v6  ;;  %v2665_v6 = vpack.c.bf16 %v303_v5, %v302_v4  ;;  %v2367_v4 = vld [vmem:[#allocation2 + $0xb8] sm:$0xff]   ;;  %v885_v5 = vlaneseq }
  0x45   : > { %469 = vmatpush1.bf16.msra.mxu0 %v463_v34  ;;  %500 = vmatprep.mubr.bf16.mxu0 %v2454_v0 }
  0x46   : > { %1909 = vmatprep.subr.msk.bf16.mxu0 %vm343_vm0, %v532_v35 }
  0x50   : > { %1906 = vmatmul.mubr.msk.bf16.vlgmr.msra.gmra.mrb[0].mxu0 %vm339_vm1, %v453_v46 }
  0x51   : > { %543 = vmatpush1.bf16.msra.mxu0 %v537_v38  ;;  %574 = vmatprep.mubr.bf16.mxu0 %v2454_v0  ;;  %v2706_v38 = vld [vmem:[%s2919_s4 + $0x7] sm:$0xff] }
  0x52   : > { %1913 = vmatprep.subr.msk.bf16.mxu0 %vm343_vm0, %v1912_v47 }
  0x5c   : > { %1910 = vmatmul.mubr.msk.bf16.vlgmr.msra.gmra.mrb[0].mxu0 %vm339_vm1, %v525_v53  ;;  %v2355_v53 = vld [vmem:[#allocation2 + $0x88] sm:$0xff]  }
  0x5d   : > { %609 = vmatpush1.bf16.msra.mxu0 %v603_v54  ;;  %640 = vmatprep.mubr.bf16.mxu0 %v2454_v0  ;;  %v300_v0 = vld [vmem:[%s2920_s5 + $0x50] sm:$0xff] }
  0x5e   : > { %v2655_v3 = vpack.c.bf16 %v301_v2, %v300_v0  ;;  %2133 = vmatprep.subr.bf16.mxu0 %v2457_v9  ;;  %v2356_v54 = vld [vmem:[#allocation2 + $0x18] sm:$0xff]   ;;  %v2365_v2 = vld [vmem:[#allocation2 + $0xb0] sm:$0xff]  }
  0x5f   : > { %v2364_v0 = vld [vmem:[#allocation2 + $0x38] sm:$0xff]  }
  0x60   : > { %2250 = vmatpush3.bf16.msra.mxu1 %v2655_v3 }
  0x61   : > { %2251 = vmatprep.subr.bf16.mxu1 %v2455_v1 }
  0x64   : > { %2253 = vmatpush3.bf16.msra.mxu1 %v2665_v6 }
  0x65   : > { %2254 = vmatprep.subr.bf16.mxu1 %v2455_v1 }
  0x68   : > { %1914 = vmatmul.mubr.msk.bf16.vlgmr.msra.gmra.mrb[0].mxu0 %vm339_vm1, %v593_v57  ;;  %2256 = vmatpush3.bf16.msra.mxu1 %v2679_v10  ;;  %v2359_v57 = vld [vmem:[#allocation2 + $0x98] sm:$0xff]  }
  0x69   : > { %2149 = vmatprep.mubr.msk.bf16.mxu0 %vm2456_vm6, %v2457_v9  ;;  %2088 = vmatprep.subr.mxu1 %v2457_v9 }
  0x6a   : > { %2134 = vmatpush3.bf16.msra.mxu0 %v2353_v51 }
  0x6b   : > { %2135 = vmatprep.subr.bf16.mxu0 %v2457_v9 }
  0x6e   : > { %2136 = vmatpush3.bf16.msra.mxu0 %v2355_v53 }
  0x6f   : > { %2137 = vmatprep.subr.bf16.mxu0 %v2457_v9 }
  0x72   : > { %2138 = vmatpush3.bf16.msra.mxu0 %v2357_v55 }
  0x73   : > { %2139 = vmatprep.subr.bf16.mxu0 %v2457_v9 }
  0x76   : > { %2140 = vmatpush3.bf16.msra.mxu0 %v2359_v57 }
  0x77   : > { %2141 = vmatprep.subr.bf16.mxu0 %v2457_v9 }
  0x7a   : > { %2142 = vmatpush3.bf16.msra.mxu0 %v2361_v59 }
  0x7b   : > { %2143 = vmatprep.subr.bf16.mxu0 %v2457_v9 }
  0x7e   : > { %2144 = vmatpush3.bf16.msra.mxu0 %v2363_v62  ;;  %v2369_v62 = vld [vmem:[#allocation2 + $0xc0] sm:$0xff]  }
  0x7f   : > { %2145 = vmatprep.subr.bf16.mxu0 %v2457_v9 }
  0x82   : > { %2146 = vmatpush3.bf16.msra.mxu0 %v2365_v2 }
  0x83   : > { %2147 = vmatprep.subr.bf16.mxu0 %v2457_v9 }
  0x86   : > { %2148 = vmatpush3.bf16.msra.mxu0 %v2367_v4 }
  0x87   : > { %2153 = vmatprep.subr.bf16.mxu0 %v2457_v9 }
 0x13b   : > { %v642_v13 = vpop.f32.mrb[0].mxu0 }
 0x13c   : > { %v2690_v14 = vadd.f32 %v1916_v11, %v642_v13  ;;  %v644_v15 = vpop.f32.mrb[1].mxu0 }
 0x13d   : > { %v646_v16 = vpop.f32.mrb[2].mxu0  ;;  %v659_v17 = vadd.f32 %v1915_v12, %v644_v15 }
 0x13e   : > { %v2692_v18 = vadd.f32 %v1916_v11, %v646_v16  ;;  %v648_v19 = vpop.f32.mrb[3].mxu0  ;;  %v723_v20 = vmul.f32 %v2690_v14, %v2690_v14 }
 0x13f   : > { %661 = vxpose.xlu0.b32.start [1/2] (short) %v659_v17, 128  ;;  %v660_v23 = vadd.f32 %v1915_v12, %v648_v19  ;;  %v2730_v12 = vshrl.u32 %v885_v5, 7 }
 0x140   : > { %v716_v21 = vadd.f32 %v2692_v18, %v2690_v14  ;;  %v724_v22 = vmul.f32 %v2692_v18, %v2692_v18 }
 0x141   : > { %v887_v13 = vsub.s32 0, %v2730_v12  ;;  %v895_v16 = vsub.s32 1, %v2730_v12 }
 0x142   : > { %v717_v24 = vrot.slane %v716_v21, 4  ;;  %v725_v25 = vadd.f32 %v724_v22, %v723_v20  ;;  %v1918_v22 = vld [vmem:[%s2919_s4 + $0x1] ss:$0 sm:$0xff] }
 0x143   : > { %662 = vxpose.xlu0.b32.end [2/2] (short) %v660_v23, 128 }
 0x144   : > { %v718_v26 = vadd.f32 %v717_v24, %v716_v21  ;;  %v726_v27 = vrot.slane %v725_v25, 4 }
 0x146   : > { %v719_v28 = vrot.slane %v718_v26, 2  ;;  %v727_v29 = vadd.f32 %v726_v27, %v725_v25  ;;  %v1919_v25 = vld [vmem:[%s2919_s4 + $0x2] ss:$0 sm:$0xff] }
 0x148   : > { %v720_v30 = vadd.f32 %v719_v28, %v718_v26  ;;  %v728_v31 = vrot.slane %v727_v29, 2 }
 0x14a   : > { %v721_v32 = vrot.slane %v720_v30, 1  ;;  %v729_v33 = vadd.f32 %v728_v31, %v727_v29 }
 0x14c   : > { %v730_v34 = vrot.slane %v729_v33, 1  ;;  %v722_v35 = vadd.f32 %v721_v32, %v720_v30 }
 0x14e   : > { %v731_v36 = vadd.f32 %v730_v34, %v729_v33 }
 0x150   : > { %v733_v37 = vsel %vm732_vm7, %v722_v35, %v731_v36 }
 0x151   : > { %2086 = vmatmul.mubr.f32.vlgmr.msra.gmra.mrb[0].mxu1 %v733_v37 }
 0x152   : > { %2090 = vmatprep.mubr.msk.f32.mxu1 %vm2456_vm6, %v2457_v9  ;;  %2089 = vmatpush3.msra.mxu1 %v2706_v38 }
 0x153   : > { %2093 = vmatprep.subr.bf16.mxu1 %v2457_v9 }
 0x224   : > { %v800_v39 = vpop.f32.mrb[0].mxu1 }
 0x225   : > { %v804_v41 = vmul.f32 %v800_v39, %v800_v39  ;;  %v2087_v42 = vpop.f32.mrb[1].mxu1 }
 0x227   : > { %v806_v45 = vrot.slane %v804_v41, 7 }
 0x229   : > { %v808_v46 = vsub.f32 %v800_v39, %v806_v45 }
 0x22b   : > { %v809_v47 = vmax.f32 %v808_v46, 0.0 }
 0x22d   : > { %v810_v48 = vsel %vm732_vm7, %v800_v39, %v809_v47  ;;  %v1920_v47 = vld [vmem:[%s275_s7] ss:$0 sm:$0xff] }
 0x22e   : > { %2091 = vmatmul.mubr.msk.f32.vlgmr.msra.gmra.mrb[2].mxu1 %vm811_vm8, %v810_v48 }
 0x22f   : > { %2109 = vmatprep.mubr.msk.bf16.mxu1 %vm2456_vm6, %v2457_v9  ;;  %2094 = vmatpush3.bf16.msra.mxu1 %v2351_v49 }
 0x230   : > { %2095 = vmatprep.subr.bf16.mxu1 %v2457_v9 }
 0x233   : > { %2096 = vmatpush3.bf16.msra.mxu1 %v2352_v50 }
 0x234   : > { %2097 = vmatprep.subr.bf16.mxu1 %v2457_v9 }
 0x237   : > { %2098 = vmatpush3.bf16.msra.mxu1 %v2354_v52 }
 0x238   : > { %2099 = vmatprep.subr.bf16.mxu1 %v2457_v9 }
 0x23b   : > { %2100 = vmatpush3.bf16.msra.mxu1 %v2356_v54  ;;  %v2366_v54 = vld [vmem:[#allocation2 + $0x40] sm:$0xff]  }
 0x23c   : > { %2101 = vmatprep.subr.bf16.mxu1 %v2457_v9 }
 0x23f   : > { %2102 = vmatpush3.bf16.msra.mxu1 %v2358_v56 }
 0x240   : > { %2103 = vmatprep.subr.bf16.mxu1 %v2457_v9 }
 0x243   : > { %2104 = vmatpush3.bf16.msra.mxu1 %v2360_v58  ;;  %v2368_v58 = vld [vmem:[#allocation2 + $0x48] sm:$0xff]  }
 0x244   : > { %2105 = vmatprep.subr.bf16.mxu1 %v2457_v9 }
 0x247   : > { %2106 = vmatpush3.bf16.msra.mxu1 %v2362_v61 }
 0x248   : > { %2107 = vmatprep.subr.bf16.mxu1 %v2457_v9 }
 0x24b   : > { %2108 = vmatpush3.bf16.msra.mxu1 %v2364_v0 }
 0x24c   : > { %2113 = vmatprep.subr.bf16.mxu1 %v2457_v9 }
 0x301   : > { %v881_v7 = vpop.f32.mrb[2].mxu1 }
 0x302   : > { %v891_v8 = vadd.f32 1e-05, %v881_v7  ;;  %v2092_v11 = vpop.f32.mrb[3].mxu1  ;;  %v888_v15 = vrot.slane %v881_v7, %v887_v13  ;;  %v2370_v7 = vld [vmem:[#allocation2 + $0x50] sm:$0xff]  }
 0x303   : > { %v2372_v11 = vld [vmem:[#allocation2 + $0x58] sm:$0xff]  }
 0x304   : > { %2391 = vrsqrt.f32 %v891_v8  ;;  %v889_v19 = vsub.f32 %v2690_v14, %v888_v15  ;;  %v890_v20 = vsub.f32 %v2692_v18, %v888_v15  ;;  %v2371_v8 = vld [vmem:[#allocation2 + $0xc8] sm:$0xff]   ;;  %v2373_v15 = vld [vmem:[#allocation2 + $0xd0] sm:$0xff]  }
 0x30e   : > { %v2392_v17 = vpop.eup %2391 }
 0x30f   : > { %v896_v21 = vrot.slane %v2392_v17, %v895_v16  ;;  %v2374_v17 = vld [vmem:[#allocation2 + $0x60] sm:$0xff]  }
 0x311   : > { %v897_v23 = vmul.f32 %v896_v21, %v889_v19  ;;  %v898_v24 = vmul.f32 %v896_v21, %v890_v20  ;;  %v2375_v19 = vld [vmem:[#allocation2 + $0xd8] sm:$0xff]   ;;  %v2376_v20 = vld [vmem:[#allocation2 + $0x68] sm:$0xff]   ;;  %v2377_v21 = vld [vmem:[#allocation2 + $0xe0] sm:$0xff]  }
 0x313   : > { %v903_v26 = vmul.f32 %v1918_v22, %v897_v23  ;;  %v904_v27 = vmul.f32 %v1918_v22, %v898_v24  ;;  %v2378_v23 = vld [vmem:[#allocation2 + $0x70] sm:$0xff]   ;;  %v2379_v24 = vld [vmem:[#allocation2 + $0xe8] sm:$0xff]  }
 0x315   : > { %v909_v28 = vadd.f32 %v1919_v25, %v903_v26  ;;  %v910_v29 = vadd.f32 %v1919_v25, %v904_v27 }
 0x317   : > { %v911_v14 = vmin.f32 %v909_v28, 20.0  ;;  %v912_v18 = vmin.f32 %v910_v29, 20.0 }
 0x319   : > { %v913_v30 = vmul.f32 1.442695, %v911_v14  ;;  %v915_v31 = vmul.f32 1.442695, %v912_v18  ;;  %v2381_v14 = vld [vmem:[#allocation2 + $0xf0] sm:$0xff]  }
 0x31b   : > { %2393 = vpow2.f32 %v913_v30 }
 0x31c   : > { %2395 = vpow2.f32 %v915_v31 }
 0x325   : > { %v2394_v32 = vpop.eup %2393 }
 0x326   : > { %v2396_v33 = vpop.eup %2395  ;;  %v917_v34 = vadd.f32 2.0, %v2394_v32 }
 0x327   : > { %v918_v35 = vadd.f32 2.0, %v2396_v33 }
 0x328   : > { %v919_v36 = vmul.f32 %v2394_v32, %v917_v34 }
 0x329   : > { %v920_v37 = vmul.f32 %v2396_v33, %v918_v35  ;;  %v2382_v35 = vld [vmem:[#allocation2 + $0xf8] sm:$0xff]  }
 0x32a   : > { %v923_v39 = vadd.f32 2.0, %v919_v36  ;;  %v921_v42 = vmul.f32 %v919_v36, %v909_v28 }
 0x32b   : > { %v924_v41 = vadd.f32 2.0, %v920_v37  ;;  %v922_v46 = vmul.f32 %v920_v37, %v910_v29  ;;  %v2380_v29 = vld [vmem:[#allocation2 + $0x78] sm:$0xff]  }
 0x32c   : > { %2397 = vrcp.f32 %v923_v39 }
 0x32d   : > { %2399 = vrcp.f32 %v924_v41  ;;  %v2383_v41 = vld [vmem:[#allocation2 + $0x100] sm:$0xff]  }
 0x336   : > { %v2398_v45 = vpop.eup %2397 }
 0x337   : > { %v2400_v48 = vpop.eup %2399  ;;  %v927_v49 = vmul.f32 %v2398_v45, %v921_v42  ;;  %v2384_v45 = vld [vmem:[#allocation2 + $0x108] sm:$0xff]  }
 0x338   : > { %v928_v50 = vmul.f32 %v2400_v48, %v922_v46  ;;  %v2386_v46 = vld [vmem:[#allocation2 + $0x118] sm:$0xff]  }
 0x339   : > { %v936_v51 = vadd.f32 %v1920_v47, %v927_v49 }
 0x33a   : > { %v937_v52 = vadd.f32 %v1920_v47, %v928_v50 }
 0x33c   : > { %v938_v53 = vpack.c.bf16 %v937_v52, %v936_v51 }
 0x33e   : > { %v940_v55 = vrot.slane %v938_v53, 7 }
 0x340   : > { %2110 = vmatmul.mubr.msk.bf16.vlgmr.msra.gmra.mrb[4].mxu1 %vm1929_vm9, %v940_v55  ;;  %v943_v56 = vsel %vm732_vm7, 0, %v940_v55  ;;  %v945_v57 = vsel %vm732_vm7, %v940_v55, 0 }
 0x341   : > { %2114 = vmatpush3.bf16.msra.mxu1 %v2366_v54  ;;  %v1193_v59 = vrot.slane %v943_v56, 1  ;;  %v1194_v61 = vrot.slane %v945_v57, 1  ;;  %2129 = vmatprep.mubr.msk.bf16.mxu1 %vm2456_vm6, %v2457_v9  ;;  %v1421_v0 = vrot.slane %v943_v56, 2  ;;  %v1422_v2 = vrot.slane %v945_v57, 2 }
 0x342   : > { %2115 = vmatprep.subr.bf16.mxu1 %v2457_v9  ;;  %v1075_v22 = vshll.u32 %v943_v56, 16  ;;  %v1073_v25 = vshrl.u32 %v943_v56, 16  ;;  %v1079_v27 = vshll.u32 %v945_v57, 16  ;;  %v1307_v28 = vshrl.u32 %v945_v57, 16 }
 0x343   : > { %v1195_v4 = vsel %vm450_vm3, %v1193_v59, %v1194_v61  ;;  %v2758_v5 = vsel %vm590_vm5, %v1421_v0, %v1422_v2 }
 0x344   : > { %2150 = vmatmul.mubr.bf16.vlgmr.msra.gmra.mrb[4].mxu0 %v1195_v4  ;;  %v1077_v26 = vrot.slane %v1075_v22, 1  ;;  %v1304_v18 = vrot.slane %v1073_v25, 1  ;;  %v1305_v31 = vrot.slane %v1075_v22, 2  ;;  %v1309_v32 = vrot.slane %v1307_v28, 1 }
 0x345   : > { %2116 = vmatpush3.bf16.msra.mxu1 %v2368_v58  ;;  %2154 = vmatpush3.bf16.msra.mxu0 %v2369_v62  ;;  %v1310_v33 = vrot.slane %v1079_v27, 2  ;;  %v1081_v34 = vrot.slane %v1079_v27, 1 }
 0x346   : > { %2117 = vmatprep.subr.bf16.mxu1 %v2457_v9  ;;  %2155 = vmatprep.subr.bf16.mxu0 %v2457_v9  ;;  %v1078_v30 = vor.u32 %v1077_v26, %v1073_v25  ;;  %v1306_v37 = vor.u32 %v1305_v31, %v1304_v18 }
 0x347   : > { %2169 = vmatprep.mubr.msk.bf16.mxu0 %vm2456_vm6, %v2457_v9  ;;  %v1311_v39 = vor.u32 %v1310_v33, %v1309_v32 }
 0x348   : > { %v1082_v36 = vsel %vm319_vm2, %v1078_v30, %v1081_v34 }
 0x349   : > { %2118 = vmatpush3.bf16.msra.mxu1 %v2370_v7  ;;  %2156 = vmatpush3.bf16.msra.mxu0 %v2371_v8  ;;  %v1312_v42 = vsel %vm516_vm4, %v1306_v37, %v1311_v39  ;;  %v1966_v39 = vld [vmem:[%s2919_s4 + $0x5] ss:$0 sm:$0xff] }
 0x34a   : > { %2119 = vmatprep.subr.bf16.mxu1 %v2457_v9  ;;  %2157 = vmatprep.subr.bf16.mxu0 %v2457_v9 }
 0x34d   : > { %2120 = vmatpush3.bf16.msra.mxu1 %v2372_v11  ;;  %2158 = vmatpush3.bf16.msra.mxu0 %v2373_v15 }
 0x34e   : > { %2121 = vmatprep.subr.bf16.mxu1 %v2457_v9  ;;  %2159 = vmatprep.subr.bf16.mxu0 %v2457_v9 }
 0x351   : > { %2122 = vmatpush3.bf16.msra.mxu1 %v2374_v17  ;;  %2160 = vmatpush3.bf16.msra.mxu0 %v2375_v19 }
 0x352   : > { %2123 = vmatprep.subr.bf16.mxu1 %v2457_v9  ;;  %2161 = vmatprep.subr.bf16.mxu0 %v2457_v9 }
 0x355   : > { %2124 = vmatpush3.bf16.msra.mxu1 %v2376_v20  ;;  %2162 = vmatpush3.bf16.msra.mxu0 %v2377_v21 }
 0x356   : > { %2125 = vmatprep.subr.bf16.mxu1 %v2457_v9  ;;  %2163 = vmatprep.subr.bf16.mxu0 %v2457_v9 }
 0x359   : > { %2126 = vmatpush3.bf16.msra.mxu1 %v2378_v23  ;;  %2164 = vmatpush3.bf16.msra.mxu0 %v2379_v24 }
 0x35a   : > { %2127 = vmatprep.subr.bf16.mxu1 %v2457_v9  ;;  %2165 = vmatprep.subr.bf16.mxu0 %v2457_v9 }
 0x35d   : > { %2128 = vmatpush3.bf16.msra.mxu1 %v2380_v29  ;;  %2166 = vmatpush3.bf16.msra.mxu0 %v2381_v14 }
 0x35e   : > { %2167 = vmatprep.subr.bf16.mxu0 %v2457_v9  ;;  %2257 = vmatprep.subr.bf16.mxu1 %v2455_v1 }
 0x360   : > { %2130 = vmatmul.mubr.bf16.vlgmr.msra.gmra.mrb[4].mxu1 %v1082_v36 }
 0x361   : > { %2168 = vmatpush3.bf16.msra.mxu0 %v2382_v35  ;;  %2259 = vmatpush3.bf16.msra.mxu1 %v2591_v40  ;;  %v2385_v40 = vld [vmem:[#allocation2 + $0x110] sm:$0xff]   ;;  %v1965_v35 = vld [vmem:[%s2919_s4 + $0x4] ss:$0 sm:$0xff] }
 0x362   : > { %2173 = vmatprep.subr.bf16.mxu0 %v2457_v9  ;;  %2260 = vmatprep.subr.bf16.mxu1 %v2455_v1 }
 0x363   : > { %2225 = vmatprep.mubr.msk.f32.mxu1 %vm2456_vm6, %v2457_v9 }
 0x364   : > { %2170 = vmatmul.mubr.bf16.vlgmr.msra.gmra.mrb[4].mxu0 %v1312_v42 }
 0x365   : > { %2174 = vmatpush3.bf16.msra.mxu0 %v2383_v41  ;;  %2189 = vmatprep.mubr.msk.bf16.mxu0 %vm2456_vm6, %v2457_v9 }
 0x366   : > { %2175 = vmatprep.subr.bf16.mxu0 %v2457_v9  ;;  %2262 = vmatpush3.bf16.msra.mxu1 %v2601_v43  ;;  %v2387_v43 = vld [vmem:[#allocation2 + $0x120] sm:$0xff]  }
 0x367   : > { %2263 = vmatprep.subr.bf16.mxu1 %v2455_v1 }
 0x369   : > { %2176 = vmatpush3.bf16.msra.mxu0 %v2384_v45 }
 0x36a   : > { %2177 = vmatprep.subr.bf16.mxu0 %v2457_v9  ;;  %2265 = vmatpush3.bf16.msra.mxu1 %v2605_v44  ;;  %v2388_v44 = vld [vmem:[#allocation2 + $0x128] sm:$0xff]  }
 0x36b   : > { %2266 = vmatprep.subr.bf16.mxu1 %v2455_v1 }
 0x36d   : > { %2178 = vmatpush3.bf16.msra.mxu0 %v2385_v40 }
 0x36e   : > { %2179 = vmatprep.subr.bf16.mxu0 %v2457_v9  ;;  %2268 = vmatpush3.bf16.msra.mxu1 %v2635_v60  ;;  %v2389_v60 = vld [vmem:[#allocation2 + $0x130] sm:$0xff]  }
 0x36f   : > { %2269 = vmatprep.subr.bf16.mxu1 %v2455_v1 }
 0x371   : > { %2180 = vmatpush3.bf16.msra.mxu0 %v2386_v46 }
 0x372   : > { %2181 = vmatprep.subr.bf16.mxu0 %v2457_v9  ;;  %2271 = vmatpush3.bf16.msra.mxu1 %v2645_v63  ;;  %v2390_v63 = vld [vmem:[#allocation2 + $0x138] sm:$0xff]  }
 0x373   : > { %2272 = vmatprep.subr.bf16.mxu1 %v2455_v1 }
 0x375   : > { %2182 = vmatpush3.bf16.msra.mxu0 %v2387_v43 }
 0x376   : > { %2183 = vmatprep.subr.bf16.mxu0 %v2457_v9  ;;  %2274 = vmatpush3.bf16.msra.mxu1 %v2655_v3 }
 0x377   : > { %2275 = vmatprep.subr.bf16.mxu1 %v2455_v1 }
 0x379   : > { %2184 = vmatpush3.bf16.msra.mxu0 %v2388_v44 }
 0x37a   : > { %2185 = vmatprep.subr.bf16.mxu0 %v2457_v9  ;;  %2277 = vmatpush3.bf16.msra.mxu1 %v2665_v6  ;;  %v1931_v6 = vld [vmem:[%s2919_s4 + $0x3] ss:$0 sm:$0xff] }
 0x37b   : > { %2278 = vmatprep.subr.bf16.mxu1 %v2455_v1 }
 0x37d   : > { %2186 = vmatpush3.bf16.msra.mxu0 %v2389_v60 }
 0x37e   : > { %2187 = vmatprep.subr.bf16.mxu0 %v2457_v9  ;;  %2280 = vmatpush3.bf16.msra.mxu1 %v2679_v10 }
 0x37f   : > { %2228 = vmatprep.subr.mxu1 %v2457_v9 }
 0x381   : > { %2188 = vmatpush3.bf16.msra.mxu0 %v2390_v63 }
 0x384   : > { %2190 = vmatmul.mubr.bf16.vlgmr.msra.gmra.mrb[4].mxu0 %v2758_v5 }
 0x433   : > { %v1166_v3 = vpop.f32.mrb[4].mxu1 }
 0x434   : > { %v2131_v47 = vpop.f32.mrb[5].mxu1  ;;  %v2281_v1 = vadd.f32 %v1931_v6, %v1166_v3 }
 0x435   : > { %v1169_v48 = vpop.f32.mrb[6].mxu1 }
 0x436   : > { %v2132_v49 = vpop.f32.mrb[7].mxu1  ;;  %v2283_v51 = vadd.f32 %v1931_v6, %v1169_v48 }
 0x457   : > { %v1507_v50 = vpop.f32.mrb[4].mxu0 }
 0x458   : > { %v2282_v52 = vadd.f32 %v2281_v1, %v1507_v50  ;;  %v2191_v53 = vpop.f32.mrb[5].mxu0 }
 0x459   : > { %v1510_v54 = vpop.f32.mrb[6].mxu0 }
 0x45a   : > { %v2284_v10 = vadd.f32 %v2283_v51, %v1510_v54  ;;  %v2192_v55 = vpop.f32.mrb[7].mxu0  ;;  %v1523_v56 = vmul.f32 %v2282_v52, %v2282_v52 }
 0x45c   : > { %v1516_v57 = vadd.f32 %v2284_v10, %v2282_v52  ;;  %v1524_v58 = vmul.f32 %v2284_v10, %v2284_v10 }
 0x45e   : > { %v1517_v59 = vrot.slane %v1516_v57, 4  ;;  %v1525_v61 = vadd.f32 %v1524_v58, %v1523_v56 }
 0x460   : > { %v1518_v62 = vadd.f32 %v1517_v59, %v1516_v57  ;;  %v1526_v0 = vrot.slane %v1525_v61, 4 }
 0x462   : > { %v1519_v2 = vrot.slane %v1518_v62, 2  ;;  %v1527_v4 = vadd.f32 %v1526_v0, %v1525_v61 }
 0x464   : > { %v1520_v5 = vadd.f32 %v1519_v2, %v1518_v62  ;;  %v1528_v7 = vrot.slane %v1527_v4, 2 }
 0x466   : > { %v1521_v8 = vrot.slane %v1520_v5, 1  ;;  %v1529_v11 = vadd.f32 %v1528_v7, %v1527_v4 }
 0x468   : > { %v1530_v15 = vrot.slane %v1529_v11, 1  ;;  %v1522_v17 = vadd.f32 %v1521_v8, %v1520_v5 }
 0x46a   : > { %v1531_v19 = vadd.f32 %v1530_v15, %v1529_v11 }
 0x46c   : > { %v1532_v20 = vsel %vm732_vm7, %v1522_v17, %v1531_v19 }
 0x46d   : > { %2226 = vmatmul.mubr.f32.vlgmr.msra.gmra.mrb[8].mxu1 %v1532_v20 }
 0x46e   : > { %2229 = vmatpush3.msra.mxu1 %v2706_v38  ;;  %2230 = vmatprep.mubr.msk.f32.mxu1 %vm2456_vm6, %v2457_v9  ;;  %v677_v9 = vpop.trf.xlu0 }
 0x46f   : > { %694 = vst.msk [vmem:[%s2820_s13] sm:$0xff] %vm693_vm10, %v677_v9 }
 0x472   : > { %v678_v38 = vpop.trf.xlu0 }
 0x473   : > { %695 = vst.msk [vmem:[%s2820_s13 + $0x8] sm:$0xff] %vm693_vm10, %v678_v38 }
 0x476   : > { %v679_v28 = vpop.trf.xlu0  ;;  %v1727_v7 = vld [vmem:[%s2820_s13] sm:$0xff] }
 0x477   : > { %696 = vst.msk [vmem:[%s2820_s13 + $0x10] sm:$0xff] %vm693_vm10, %v679_v28 }
 0x47a   : > { %v680_v54 = vpop.trf.xlu0  ;;  %v1728_v15 = vld [vmem:[%s2820_s13 + $0x8] sm:$0xff] }
 0x47b   : > { %697 = vst.msk [vmem:[%s2820_s13 + $0x18] sm:$0xff] %vm693_vm10, %v680_v54 }
 0x47e   : > { %v1729_v20 = vld [vmem:[%s2820_s13 + $0x10] sm:$0xff] }
 0x540   : > { %v1599_v21 = vpop.f32.mrb[8].mxu1 }
 0x541   : > { %v1603_v22 = vmul.f32 %v1599_v21, %v1599_v21  ;;  %v2227_v23 = vpop.f32.mrb[9].mxu1 }
 0x542   : > { %v1730_v23 = vld [vmem:[%s2820_s13 + $0x18] sm:$0xff] }
 0x543   : > { %v1605_v24 = vrot.slane %v1603_v22, 7 }
 0x545   : > { %v1607_v25 = vsub.f32 %v1599_v21, %v1605_v24 }
 0x547   : > { %v1608_v26 = vmax.f32 %v1607_v25, 0.0 }
 0x549   : > { %v1609_v27 = vsel %vm732_vm7, %v1599_v21, %v1608_v26 }
 0x54a   : > { %2231 = vmatmul.mubr.msk.f32.vlgmr.msra.gmra.mrb[10].mxu1 %vm811_vm8, %v1609_v27 }
 0x61d   : > { %v1679_v29 = vpop.f32.mrb[10].mxu1 }
 0x61e   : > { %v1689_v14 = vadd.f32 1e-05, %v1679_v29  ;;  %v2232_v18 = vpop.f32.mrb[11].mxu1  ;;  %v1686_v30 = vrot.slane %v1679_v29, %v887_v13 }
 0x620   : > { %2401 = vrsqrt.f32 %v1689_v14  ;;  %v1687_v32 = vsub.f32 %v2282_v52, %v1686_v30  ;;  %v1688_v33 = vsub.f32 %v2284_v10, %v1686_v30  ;;  %v681_v10 = vpop.trf.xlu0 }
 0x621   : > { %698 = vst.msk [vmem:[%s2820_s13 + $0x20] sm:$0xff] %vm693_vm10, %v681_v10 }
 0x624   : > { %v682_v55 = vpop.trf.xlu0 }
 0x625   : > { %699 = vst.msk [vmem:[%s2820_s13 + $0x28] sm:$0xff] %vm693_vm10, %v682_v55 }
 0x628   : > { %v683_v56 = vpop.trf.xlu0  ;;  %v1731_v26 = vld [vmem:[%s2820_s13 + $0x20] sm:$0xff] }
 0x629   : > { %700 = vst.msk [vmem:[%s2820_s13 + $0x30] sm:$0xff] %vm693_vm10, %v683_v56 }
 0x62a   : > { %v2402_v31 = vpop.eup %2401 }
 0x62b   : > { %v1694_v34 = vrot.slane %v2402_v31, %v895_v16 }
 0x62c   : > { %v684_v57 = vpop.trf.xlu0  ;;  %v1732_v38 = vld [vmem:[%s2820_s13 + $0x28] sm:$0xff] }
 0x62d   : > { %v1695_v36 = vmul.f32 %v1694_v34, %v1687_v32  ;;  %v1696_v37 = vmul.f32 %v1694_v34, %v1688_v33  ;;  %701 = vst.msk [vmem:[%s2820_s13 + $0x38] sm:$0xff] %vm693_vm10, %v684_v57 }
 0x62f   : > { %v1701_v41 = vmul.f32 %v1965_v35, %v1695_v36  ;;  %v1702_v42 = vmul.f32 %v1965_v35, %v1696_v37 }
 0x630   : > { %v685_v58 = vpop.trf.xlu0  ;;  %v1733_v14 = vld [vmem:[%s2820_s13 + $0x30] sm:$0xff] }
 0x631   : > { %v1707_v45 = vadd.f32 %v1966_v39, %v1701_v41  ;;  %v1708_v13 = vadd.f32 %v1966_v39, %v1702_v42  ;;  %702 = vst.msk [vmem:[%s2820_s13 + $0x40] sm:$0xff] %vm693_vm10, %v685_v58 }
 0x633   : > { %v1709_v40 = vmin.f32 %v1707_v45, 20.0  ;;  %v1710_v46 = vmin.f32 %v1708_v13, 20.0 }
 0x634   : > { %v686_v59 = vpop.trf.xlu0  ;;  %v1734_v31 = vld [vmem:[%s2820_s13 + $0x38] sm:$0xff] }
 0x635   : > { %v1711_v43 = vmul.f32 1.442695, %v1709_v40  ;;  %v1713_v44 = vmul.f32 1.442695, %v1710_v46  ;;  %703 = vst.msk [vmem:[%s2820_s13 + $0x48] sm:$0xff] %vm693_vm10, %v686_v59 }
 0x637   : > { %2403 = vpow2.f32 %v1711_v43 }
 0x638   : > { %2405 = vpow2.f32 %v1713_v44  ;;  %v687_v61 = vpop.trf.xlu0  ;;  %v1735_v34 = vld [vmem:[%s2820_s13 + $0x40] sm:$0xff] }
 0x639   : > { %704 = vst.msk [vmem:[%s2820_s13 + $0x50] sm:$0xff] %vm693_vm10, %v687_v61 }
 0x63c   : > { %v688_v62 = vpop.trf.xlu0  ;;  %v1736_v37 = vld [vmem:[%s2820_s13 + $0x48] sm:$0xff] }
 0x63d   : > { %705 = vst.msk [vmem:[%s2820_s13 + $0x58] sm:$0xff] %vm693_vm10, %v688_v62 }
 0x640   : > { %v689_v0 = vpop.trf.xlu0  ;;  %v1737_v42 = vld [vmem:[%s2820_s13 + $0x50] sm:$0xff] }
 0x641   : > { %v2404_v12 = vpop.eup %2403  ;;  %706 = vst.msk [vmem:[%s2820_s13 + $0x60] sm:$0xff] %vm693_vm10, %v689_v0 }
 0x642   : > { %v2406_v16 = vpop.eup %2405  ;;  %v1715_v60 = vadd.f32 2.0, %v2404_v12 }
 0x643   : > { %v1716_v63 = vadd.f32 2.0, %v2406_v16 }
 0x644   : > { %v1717_v3 = vmul.f32 %v2404_v12, %v1715_v60  ;;  %v690_v2 = vpop.trf.xlu0  ;;  %v1738_v40 = vld [vmem:[%s2820_s13 + $0x58] sm:$0xff] }
 0x645   : > { %v1718_v47 = vmul.f32 %v2406_v16, %v1716_v63  ;;  %707 = vst.msk [vmem:[%s2820_s13 + $0x68] sm:$0xff] %vm693_vm10, %v690_v2 }
 0x646   : > { %v1721_v48 = vadd.f32 2.0, %v1717_v3  ;;  %v1719_v6 = vmul.f32 %v1717_v3, %v1707_v45 }
 0x647   : > { %v1722_v49 = vadd.f32 2.0, %v1718_v47  ;;  %v1720_v52 = vmul.f32 %v1718_v47, %v1708_v13 }
 0x648   : > { %2407 = vrcp.f32 %v1721_v48  ;;  %v691_v4 = vpop.trf.xlu0  ;;  %v1739_v44 = vld [vmem:[%s2820_s13 + $0x60] sm:$0xff] }
 0x649   : > { %2409 = vrcp.f32 %v1722_v49  ;;  %708 = vst.msk [vmem:[%s2820_s13 + $0x70] sm:$0xff] %vm693_vm10, %v691_v4 }
 0x64c   : > { %v692_v5 = vpop.trf.xlu0  ;;  %v1740_v60 = vld [vmem:[%s2820_s13 + $0x68] sm:$0xff] }
 0x64d   : > { %709 = vst.msk [vmem:[%s2820_s13 + $0x78] sm:$0xff] %vm693_vm10, %v692_v5 }
 0x650   : > { %v1741_v47 = vld [vmem:[%s2820_s13 + $0x70] sm:$0xff] }
 0x652   : > { %v2408_v1 = vpop.eup %2407 }
 0x653   : > { %v1725_v50 = vmul.f32 %v2408_v1, %v1719_v6  ;;  %v2410_v51 = vpop.eup %2409 }
 0x654   : > { %v1726_v53 = vmul.f32 %v2410_v51, %v1720_v52  ;;  %v1742_v6 = vld [vmem:[%s2820_s13 + $0x78] sm:$0xff] }
 0x655   : > { %1743 = vxpose.xlu1.b32.start [1/2] (short) %v1725_v50, 128 }
 0x659   : > { %1744 = vxpose.xlu1.b32.end [2/2] (short) %v1726_v53, 128 }
 0x6d5   : > { %v1759_v8 = vpop.trf.xlu1 }
 0x6d6   : > { %v1775_v11 = vadd.f32 %v1759_v8, %v1727_v7 }
 0x6d8   : > { %1791 = vst.msk [vmem:[%s2820_s13] sm:$0xff] %vm693_vm10, %v1775_v11 }
 0x6d9   : > { %v1760_v17 = vpop.trf.xlu1 }
 0x6da   : > { %v1776_v19 = vadd.f32 %v1760_v17, %v1728_v15 }
 0x6dc   : > { %1792 = vst.msk [vmem:[%s2820_s13 + $0x8] sm:$0xff] %vm693_vm10, %v1776_v19 }
 0x6dd   : > { %v1761_v21 = vpop.trf.xlu1 }
 0x6de   : > { %v1777_v22 = vadd.f32 %v1761_v21, %v1729_v20 }
 0x6e0   : > { %1793 = vst.msk [vmem:[%s2820_s13 + $0x10] sm:$0xff] %vm693_vm10, %v1777_v22 }
 0x6e1   : > { %v1762_v24 = vpop.trf.xlu1 }
 0x6e2   : > { %v1778_v25 = vadd.f32 %v1762_v24, %v1730_v23 }
 0x6e4   : > { %1794 = vst.msk [vmem:[%s2820_s13 + $0x18] sm:$0xff] %vm693_vm10, %v1778_v25 }
 0x6e5   : > { %v1763_v27 = vpop.trf.xlu1 }
 0x6e6   : > { %v1779_v9 = vadd.f32 %v1763_v27, %v1731_v26 }
 0x6e8   : > { %1795 = vst.msk [vmem:[%s2820_s13 + $0x20] sm:$0xff] %vm693_vm10, %v1779_v9 }
 0x6e9   : > { %v1764_v28 = vpop.trf.xlu1 }
 0x6ea   : > { %v1780_v29 = vadd.f32 %v1764_v28, %v1732_v38 }
 0x6ec   : > { %1796 = vst.msk [vmem:[%s2820_s13 + $0x28] sm:$0xff] %vm693_vm10, %v1780_v29 }
 0x6ed   : > { %v1765_v18 = vpop.trf.xlu1 }
 0x6ee   : > { %v1781_v30 = vadd.f32 %v1765_v18, %v1733_v14 }
 0x6f0   : > { %1797 = vst.msk [vmem:[%s2820_s13 + $0x30] sm:$0xff] %vm693_vm10, %v1781_v30 }
 0x6f1   : > { %v1766_v32 = vpop.trf.xlu1 }
 0x6f2   : > { %v1782_v33 = vadd.f32 %v1766_v32, %v1734_v31 }
 0x6f4   : > { %1798 = vst.msk [vmem:[%s2820_s13 + $0x38] sm:$0xff] %vm693_vm10, %v1782_v33 }
 0x6f5   : > { %v1767_v35 = vpop.trf.xlu1 }
 0x6f6   : > { %v1783_v36 = vadd.f32 %v1767_v35, %v1735_v34 }
 0x6f8   : > { %1799 = vst.msk [vmem:[%s2820_s13 + $0x40] sm:$0xff] %vm693_vm10, %v1783_v36 }
 0x6f9   : > { %v1768_v39 = vpop.trf.xlu1 }
 0x6fa   : > { %v1784_v41 = vadd.f32 %v1768_v39, %v1736_v37 }
 0x6fc   : > { %1800 = vst.msk [vmem:[%s2820_s13 + $0x48] sm:$0xff] %vm693_vm10, %v1784_v41 }
 0x6fd   : > { %v1769_v45 = vpop.trf.xlu1 }
 0x6fe   : > { %v1785_v13 = vadd.f32 %v1769_v45, %v1737_v42 }
 0x700   : > { %1801 = vst.msk [vmem:[%s2820_s13 + $0x50] sm:$0xff] %vm693_vm10, %v1785_v13 }
 0x701   : > { %v1770_v46 = vpop.trf.xlu1 }
 0x702   : > { %v1786_v43 = vadd.f32 %v1770_v46, %v1738_v40 }
 0x704   : > { %1802 = vst.msk [vmem:[%s2820_s13 + $0x58] sm:$0xff] %vm693_vm10, %v1786_v43 }
 0x705   : > { %v1771_v12 = vpop.trf.xlu1 }
 0x706   : > { %v1787_v16 = vadd.f32 %v1771_v12, %v1739_v44 }
 0x708   : > { %1803 = vst.msk [vmem:[%s2820_s13 + $0x60] sm:$0xff] %vm693_vm10, %v1787_v16 }
 0x709   : > { %v1772_v63 = vpop.trf.xlu1 }
 0x70a   : > { %v1788_v3 = vadd.f32 %v1772_v63, %v1740_v60 }
 0x70c   : > { %1804 = vst.msk [vmem:[%s2820_s13 + $0x68] sm:$0xff] %vm693_vm10, %v1788_v3 }
 0x70d   : > { %v1773_v48 = vpop.trf.xlu1 }
 0x70e   : > { %v1789_v49 = vadd.f32 %v1773_v48, %v1741_v47 }
 0x710   : > { %1805 = vst.msk [vmem:[%s2820_s13 + $0x70] sm:$0xff] %vm693_vm10, %v1789_v49 }
 0x711   : > { %v1774_v1 = vpop.trf.xlu1 }
 0x712   : > { %v1790_v50 = vadd.f32 %v1774_v1, %v1742_v6 }
 0x714   : > { %1806 = vst.msk [vmem:[%s2820_s13 + $0x78] sm:$0xff] %vm693_vm10, %v1790_v50 }
 0x715 PF: > { %s17_s21 = sadd.s32 1, %s2449_s21  }
 0x716   : > { %p14_p3 = scmp.ge.s32.totalorder %s17_s21, 4  }
 0x718   :  { %16 = sbr.rel (!%p14_p3) target bundleno = 1 (0x1), region = 82 }
 0x71f   :  { %1828 = vsyncpa [#allocation3], 1 }
 0x720   :  { %1830 = vsyncpa [#allocation3 + $0x1], 1 }

</bundles_post_ra>
